<compile_context>
chip_gen: v7x
topology: tpu7x:2x2x1
jax: 0.10.0
libtpu: 0.0.40
codegen_flags: <defaults>
</compile_context>

<pallas_src>
import functools

import jax
import jax.numpy as jnp
from jax import lax
from jax.experimental import pallas as pl
from jax.experimental.pallas import tpu as pltpu


# ----------------------------- Pallas kernel --------------------------------
def _encoder_kernel(
    a_ref, r_ref, o_ref,                               # (T*B, dim) sequence inputs
    Wa, ba, Wr, br, Wo, bo,                            # action / reward / observ embedders
    Wih_ar, Wih_az, Wih_an,                            # input->gate, action rows,  per gate
    Wih_rr, Wih_rz, Wih_rn,                            # input->gate, reward rows,  per gate
    Wih_or, Wih_oz, Wih_on,                            # input->gate, observ rows,  per gate
    bih_r, bih_z, bih_n,                               # input->gate bias, per gate
    Whh_r, Whh_z, Whh_n, bhh_r, bhh_z, bhh_n,          # hidden->gate, per gate
    Waf, baf, Wmulv, bmulv,                            # fc_after_rnn, fused [fc_mu | fc_logvar]
    latent_out,                                        # (T*B, 2*latent_dim) output
    gi_r_ref, gi_z_ref, gi_n_ref, hs_ref,              # VMEM scratch, each (T*B, H)
    *, T, B, H,
):
    f32 = jnp.float32

    def mm(x, w_ref):
        return jnp.dot(x, w_ref[...], preferred_element_type=f32)

    # ---------- batched (T*B, .) embedders ----------
    ea = jax.nn.relu(mm(a_ref[...], Wa) + ba[...])              # (TB, a_emb)    MXU
    er = jax.nn.relu(r_ref[...] * Wr[...] + br[...])            # (TB, r_emb)    rank-1 -> VPU
    eo = jax.nn.relu(mm(o_ref[...], Wo) + bo[...])              # (TB, o_emb)    MXU

    # ---------- batched input-side gate projections (one scratch slab per gate) ----------
    gi_r_ref[...] = mm(ea, Wih_ar) + mm(er, Wih_rr) + mm(eo, Wih_or) + bih_r[...]
    gi_z_ref[...] = mm(ea, Wih_az) + mm(er, Wih_rz) + mm(eo, Wih_oz) + bih_z[...]
    gi_n_ref[...] = mm(ea, Wih_an) + mm(er, Wih_rn) + mm(eo, Wih_on) + bih_n[...]

    # ---------- sequential part: ONLY the h-dependent recurrence ----------
    # TODO(synk): ODERNN source is not provided; a GRU-cell recurrence is used as the
    # update rule (matching the module's orthogonal-weight / zero-bias RNN init intent).
    h = jnp.zeros((B, H), f32)
    for t in range(T):                      # static unroll -> static slice offsets only
        lo = t * B
        gh_r = mm(h, Whh_r) + bhh_r[...]
        gh_z = mm(h, Whh_z) + bhh_z[...]
        gh_n = mm(h, Whh_n) + bhh_n[...]
        r_g = jax.nn.sigmoid(gi_r_ref[lo:lo + B, :] + gh_r)
        z_g = jax.nn.sigmoid(gi_z_ref[lo:lo + B, :] + gh_z)
        n_g = jnp.tanh(gi_n_ref[lo:lo + B, :] + r_g * gh_n)
        h = (1.0 - z_g) * n_g + z_g * h
        hs_ref[lo:lo + B, :] = h

    # ---------- batched encoder heads, lane-dense [mu | logvar] output ----------
    s = mm(hs_ref[...], Waf) + baf[...]                 # (TB, latent_dim)
    latent_out[...] = mm(s, Wmulv) + bmulv[...]         # (TB, 2*latent_dim) == [mu | logvar]


# ------------------------------- wrapper -------------------------------------
@jax.jit
def encoder_forward(prev_actions, rewards, observs, params):
    T, B, action_dim = prev_actions.shape
    obs_dim = observs.shape[-1]
    a_emb = params["Wa"].shape[1]
    r_emb = params["Wr"].shape[1]
    H = params["Whh"].shape[0]
    latent_dim = params["Wmu"].shape[1]
    TB = T * B

    # ----- one-time wrapper-side weight preprocessing (cheap XLA slices/concats) -----
    def gate_split(W):                                   # (., 3H) -> three (., H)
        return W[:, :H], W[:, H:2 * H], W[:, 2 * H:]

    Wih, bih = params["Wih"], params["bih"]
    Wih_a, Wih_r, Wih_o = (Wih[:a_emb],
                           Wih[a_emb:a_emb + r_emb],
                           Wih[a_emb + r_emb:])          # rows per input group
    Wih_ar, Wih_az, Wih_an = gate_split(Wih_a)
    Wih_rr, Wih_rz, Wih_rn = gate_split(Wih_r)
    Wih_or, Wih_oz, Wih_on = gate_split(Wih_o)
    bih_r, bih_z, bih_n = gate_split(bih)
    Whh_r, Whh_z, Whh_n = gate_split(params["Whh"])
    bhh_r, bhh_z, bhh_n = gate_split(params["bhh"])
    Wmulv = jnp.concatenate([params["Wmu"], params["Wlv"]], axis=1)   # (latent, 2*latent)
    bmulv = jnp.concatenate([params["bmu"], params["blv"]], axis=1)   # (1, 2*latent)

    a2d = prev_actions.reshape(TB, action_dim).astype(jnp.float32)
    r2d = rewards.reshape(TB, 1).astype(jnp.float32)
    o2d = observs.reshape(TB, obs_dim).astype(jnp.float32)

    inputs = (
        a2d, r2d, o2d,
        params["Wa"], params["ba"], params["Wr"], params["br"],
        params["Wo"], params["bo"],
        Wih_ar, Wih_az, Wih_an,
        Wih_rr, Wih_rz, Wih_rn,
        Wih_or, Wih_oz, Wih_on,
        bih_r, bih_z, bih_n,
        Whh_r, Whh_z, Whh_n, bhh_r, bhh_z, bhh_n,
        params["Waf"], params["baf"], Wmulv, bmulv,
    )

    def full_spec(arr):
        nd = arr.ndim
        return pl.BlockSpec(arr.shape, lambda i, _nd=nd: (0,) * _nd)

    latent2d = pl.pallas_call(
        functools.partial(_encoder_kernel, T=T, B=B, H=H),
        out_shape=jax.ShapeDtypeStruct((TB, 2 * latent_dim), jnp.float32),
        grid_spec=pltpu.PrefetchScalarGridSpec(
            num_scalar_prefetch=0,
            grid=(1,),                                      # whole sequence resident in VMEM
            in_specs=[full_spec(x) for x in inputs],
            out_specs=pl.BlockSpec((TB, 2 * latent_dim), lambda i: (0, 0)),
            scratch_shapes=[pltpu.VMEM((TB, H), jnp.float32)] * 4,
        ),
        compiler_params=pltpu.CompilerParams(
            dimension_semantics=("arbitrary",),             # carried RNN state -> sequential
        ),
    )(*inputs)

    latent = latent2d.reshape(T, B, 2 * latent_dim)
    latent_mean = latent[..., :latent_dim]
    latent_logvar = latent[..., latent_dim:]
    return latent, latent_mean, latent_logvar


# --------------------------- pure-JAX reference -------------------------------
def reference_forward(prev_actions, rewards, observs, p):
    def lin(x, W, b):
        return x @ W + b

    ea = jax.nn.relu(lin(prev_actions, p["Wa"], p["ba"]))
    er = jax.nn.relu(lin(rewards, p["Wr"], p["br"]))
    eo = jax.nn.relu(lin(observs, p["Wo"], p["bo"]))
    x = jnp.concatenate([ea, er, eo], axis=-1)            # (T, B, rnn_in)
    H = p["Whh"].shape[0]

    def step(h, xt):
        gi = lin(xt, p["Wih"], p["bih"])
        gh = lin(h, p["Whh"], p["bhh"])
        r = jax.nn.sigmoid(gi[:, :H] + gh[:, :H])
        z = jax.nn.sigmoid(gi[:, H:2 * H] + gh[:, H:2 * H])
        n = jnp.tanh(gi[:, 2 * H:] + r * gh[:, 2 * H:])
        hn = (1.0 - z) * n + z * h
        return hn, hn

    h0 = jnp.zeros((prev_actions.shape[1], H), jnp.float32)
    _, hs = lax.scan(step, h0, x)                          # (T, B, H)

    s = lin(hs, p["Waf"], p["baf"])
    mu = lin(s, p["Wmu"], p["bmu"])
    lv = lin(s, p["Wlv"], p["blv"])
    latent = jnp.concatenate([mu, lv], axis=-1)
    return latent, mu, lv


# ------------------------------ parameter init --------------------------------
def init_params(key, obs_dim, action_dim, a_emb, o_emb, r_emb, H, latent_dim):
    rnn_in = a_emb + r_emb + o_emb
    shapes = {
        "Wa": (action_dim, a_emb), "ba": (1, a_emb),
        "Wr": (1, r_emb), "br": (1, r_emb),
        "Wo": (obs_dim, o_emb), "bo": (1, o_emb),
        "Wih": (rnn_in, 3 * H), "bih": (1, 3 * H),
        "Whh": (H, 3 * H), "bhh": (1, 3 * H),
        "Waf": (H, latent_dim), "baf": (1, latent_dim),
        "Wmu": (latent_dim, latent_dim), "bmu": (1, latent_dim),
        "Wlv": (latent_dim, latent_dim), "blv": (1, latent_dim),
    }
    # The module inits RNN biases to 0; random values are used here so the correctness
    # check also exercises the per-gate bias splits in the kernel.
    params = {}
    keys = jax.random.split(key, len(shapes))
    for k, (name, shp) in zip(keys, shapes.items()):
        params[name] = 0.1 * jax.random.normal(k, shp, jnp.float32)
    return params


# ---------------------------------- main ---------------------------------------
if __name__ == "__main__":
    # small shapes consistent with the module's forward (T+1 time-major sequences)
    T, B = 8, 2
    obs_dim, action_dim = 10, 4
    action_embedding_size, observ_embedding_size, reward_embedding_size = 8, 16, 8
    rnn_hidden_size, latent_dim = 32, 64                  # module hardcodes latent_dim = 64

    key = jax.random.PRNGKey(0)
    kp, ka, kr, ko = jax.random.split(key, 4)
    params = init_params(kp, obs_dim, action_dim, action_embedding_size,
                         observ_embedding_size, reward_embedding_size,
                         rnn_hidden_size, latent_dim)

    prev_actions = jax.random.normal(ka, (T, B, action_dim), jnp.float32)
    rewards = jax.random.normal(kr, (T, B, 1), jnp.float32)
    observs = jax.random.normal(ko, (T, B, obs_dim), jnp.float32)

    latent, mu, lv = encoder_forward(prev_actions, rewards, observs, params)
    jax.block_until_ready((latent, mu, lv))

    rlat, rmu, rlv = reference_forward(prev_actions, rewards, observs, params)
    assert jnp.allclose(latent, rlat, atol=1e-4, rtol=1e-4)
    assert jnp.allclose(mu, rmu, atol=1e-4, rtol=1e-4)
    assert jnp.allclose(lv, rlv, atol=1e-4, rtol=1e-4)

    print("KERNEL_OK")
</pallas_src>

<mosaic_0001>
module attributes {stable_mosaic.version = 11 : i64} {
  func.func @_encoder_kernel(%arg0: i32, %arg1: memref<16x4xf32, #tpu.memory_space<vmem>>, %arg2: memref<16x1xf32, #tpu.memory_space<vmem>>, %arg3: memref<16x10xf32, #tpu.memory_space<vmem>>, %arg4: memref<4x8xf32, #tpu.memory_space<vmem>>, %arg5: memref<1x8xf32, #tpu.memory_space<vmem>>, %arg6: memref<1x8xf32, #tpu.memory_space<vmem>>, %arg7: memref<1x8xf32, #tpu.memory_space<vmem>>, %arg8: memref<10x16xf32, #tpu.memory_space<vmem>>, %arg9: memref<1x16xf32, #tpu.memory_space<vmem>>, %arg10: memref<8x32xf32, #tpu.memory_space<vmem>>, %arg11: memref<8x32xf32, #tpu.memory_space<vmem>>, %arg12: memref<8x32xf32, #tpu.memory_space<vmem>>, %arg13: memref<8x32xf32, #tpu.memory_space<vmem>>, %arg14: memref<8x32xf32, #tpu.memory_space<vmem>>, %arg15: memref<8x32xf32, #tpu.memory_space<vmem>>, %arg16: memref<16x32xf32, #tpu.memory_space<vmem>>, %arg17: memref<16x32xf32, #tpu.memory_space<vmem>>, %arg18: memref<16x32xf32, #tpu.memory_space<vmem>>, %arg19: memref<1x32xf32, #tpu.memory_space<vmem>>, %arg20: memref<1x32xf32, #tpu.memory_space<vmem>>, %arg21: memref<1x32xf32, #tpu.memory_space<vmem>>, %arg22: memref<32x32xf32, #tpu.memory_space<vmem>>, %arg23: memref<32x32xf32, #tpu.memory_space<vmem>>, %arg24: memref<32x32xf32, #tpu.memory_space<vmem>>, %arg25: memref<1x32xf32, #tpu.memory_space<vmem>>, %arg26: memref<1x32xf32, #tpu.memory_space<vmem>>, %arg27: memref<1x32xf32, #tpu.memory_space<vmem>>, %arg28: memref<32x64xf32, #tpu.memory_space<vmem>>, %arg29: memref<1x64xf32, #tpu.memory_space<vmem>>, %arg30: memref<64x128xf32, #tpu.memory_space<vmem>>, %arg31: memref<1x128xf32, #tpu.memory_space<vmem>>, %arg32: memref<16x128xf32, #tpu.memory_space<vmem>>, %arg33: memref<16x32xf32, #tpu.memory_space<vmem>>, %arg34: memref<16x32xf32, #tpu.memory_space<vmem>>, %arg35: memref<16x32xf32, #tpu.memory_space<vmem>>, %arg36: memref<16x32xf32, #tpu.memory_space<vmem>>) attributes {dimension_semantics = [#tpu.dimension_semantics<arbitrary>], iteration_bounds = array<i64: 1>, scalar_prefetch = 0 : i64, scratch_operands = 4 : i64, tpu.core_type = #tpu.core_type<tc>, window_params = [{pipeline_mode = #tpu.pipeline_mode<synchronous>, transform_indices = @transform_0, window_bounds = array<i64: 16, 4>}, {pipeline_mode = #tpu.pipeline_mode<synchronous>, transform_indices = @transform_1, window_bounds = array<i64: 16, 1>}, {pipeline_mode = #tpu.pipeline_mode<synchronous>, transform_indices = @transform_2, window_bounds = array<i64: 16, 10>}, {pipeline_mode = #tpu.pipeline_mode<synchronous>, transform_indices = @transform_3, window_bounds = array<i64: 4, 8>}, {pipeline_mode = #tpu.pipeline_mode<synchronous>, transform_indices = @transform_4, window_bounds = array<i64: 1, 8>}, {pipeline_mode = #tpu.pipeline_mode<synchronous>, transform_indices = @transform_5, window_bounds = array<i64: 1, 8>}, {pipeline_mode = #tpu.pipeline_mode<synchronous>, transform_indices = @transform_6, window_bounds = array<i64: 1, 8>}, {pipeline_mode = #tpu.pipeline_mode<synchronous>, transform_indices = @transform_7, window_bounds = array<i64: 10, 16>}, {pipeline_mode = #tpu.pipeline_mode<synchronous>, transform_indices = @transform_8, window_bounds = array<i64: 1, 16>}, {pipeline_mode = #tpu.pipeline_mode<synchronous>, transform_indices = @transform_9, window_bounds = array<i64: 8, 32>}, {pipeline_mode = #tpu.pipeline_mode<synchronous>, transform_indices = @transform_10, window_bounds = array<i64: 8, 32>}, {pipeline_mode = #tpu.pipeline_mode<synchronous>, transform_indices = @transform_11, window_bounds = array<i64: 8, 32>}, {pipeline_mode = #tpu.pipeline_mode<synchronous>, transform_indices = @transform_12, window_bounds = array<i64: 8, 32>}, {pipeline_mode = #tpu.pipeline_mode<synchronous>, transform_indices = @transform_13, window_bounds = array<i64: 8, 32>}, {pipeline_mode = #tpu.pipeline_mode<synchronous>, transform_indices = @transform_14, window_bounds = array<i64: 8, 32>}, {pipeline_mode = #tpu.pipeline_mode<synchronous>, transform_indices = @transform_15, window_bounds = array<i64: 16, 32>}, {pipeline_mode = #tpu.pipeline_mode<synchronous>, transform_indices = @transform_16, window_bounds = array<i64: 16, 32>}, {pipeline_mode = #tpu.pipeline_mode<synchronous>, transform_indices = @transform_17, window_bounds = array<i64: 16, 32>}, {pipeline_mode = #tpu.pipeline_mode<synchronous>, transform_indices = @transform_18, window_bounds = array<i64: 1, 32>}, {pipeline_mode = #tpu.pipeline_mode<synchronous>, transform_indices = @transform_19, window_bounds = array<i64: 1, 32>}, {pipeline_mode = #tpu.pipeline_mode<synchronous>, transform_indices = @transform_20, window_bounds = array<i64: 1, 32>}, {pipeline_mode = #tpu.pipeline_mode<synchronous>, transform_indices = @transform_21, window_bounds = array<i64: 32, 32>}, {pipeline_mode = #tpu.pipeline_mode<synchronous>, transform_indices = @transform_22, window_bounds = array<i64: 32, 32>}, {pipeline_mode = #tpu.pipeline_mode<synchronous>, transform_indices = @transform_23, window_bounds = array<i64: 32, 32>}, {pipeline_mode = #tpu.pipeline_mode<synchronous>, transform_indices = @transform_24, window_bounds = array<i64: 1, 32>}, {pipeline_mode = #tpu.pipeline_mode<synchronous>, transform_indices = @transform_25, window_bounds = array<i64: 1, 32>}, {pipeline_mode = #tpu.pipeline_mode<synchronous>, transform_indices = @transform_26, window_bounds = array<i64: 1, 32>}, {pipeline_mode = #tpu.pipeline_mode<synchronous>, transform_indices = @transform_27, window_bounds = array<i64: 32, 64>}, {pipeline_mode = #tpu.pipeline_mode<synchronous>, transform_indices = @transform_28, window_bounds = array<i64: 1, 64>}, {pipeline_mode = #tpu.pipeline_mode<synchronous>, transform_indices = @transform_29, window_bounds = array<i64: 64, 128>}, {pipeline_mode = #tpu.pipeline_mode<synchronous>, transform_indices = @transform_30, window_bounds = array<i64: 1, 128>}, {pipeline_mode = #tpu.pipeline_mode<synchronous>, transform_indices = @transform_31, window_bounds = array<i64: 16, 128>}]} {
    %c0 = arith.constant 0 : index
    %c0_0 = arith.constant 0 : index
    %0 = vector.load %arg1[%c0, %c0_0] : memref<16x4xf32, #tpu.memory_space<vmem>>, vector<16x4xf32>
    %c0_1 = arith.constant 0 : index
    %c0_2 = arith.constant 0 : index
    %1 = vector.load %arg4[%c0_1, %c0_2] : memref<4x8xf32, #tpu.memory_space<vmem>>, vector<4x8xf32>
    %cst = arith.constant dense<0.000000e+00> : vector<16x8xf32>
    %2 = tpu.matmul %0, %1, %cst {dimension_numbers = #tpu.dot_dimension_numbers<[1], [0], [0], [1], [0, 0, 1, 1], [], []>} : vector<16x4xf32>, vector<4x8xf32>, vector<16x8xf32> -> vector<16x8xf32>
    %c0_3 = arith.constant 0 : index
    %c0_4 = arith.constant 0 : index
    %3 = vector.load %arg5[%c0_3, %c0_4] : memref<1x8xf32, #tpu.memory_space<vmem>>, vector<1x8xf32>
    %4 = vector.broadcast %3 : vector<1x8xf32> to vector<16x8xf32>
    %5 = arith.addf %2, %4 : vector<16x8xf32>
    %cst_5 = arith.constant 0.000000e+00 : f32
    %6 = vector.broadcast %cst_5 : f32 to vector<16x8xf32>
    %7 = arith.maximumf %5, %6 : vector<16x8xf32>
    %c0_6 = arith.constant 0 : index
    %c0_7 = arith.constant 0 : index
    %8 = vector.load %arg2[%c0_6, %c0_7] : memref<16x1xf32, #tpu.memory_space<vmem>>, vector<16x1xf32>
    %c0_8 = arith.constant 0 : index
    %c0_9 = arith.constant 0 : index
    %9 = vector.load %arg6[%c0_8, %c0_9] : memref<1x8xf32, #tpu.memory_space<vmem>>, vector<1x8xf32>
    %10 = vector.broadcast %8 : vector<16x1xf32> to vector<16x8xf32>
    %11 = vector.broadcast %9 : vector<1x8xf32> to vector<16x8xf32>
    %12 = arith.mulf %10, %11 : vector<16x8xf32>
    %c0_10 = arith.constant 0 : index
    %c0_11 = arith.constant 0 : index
    %13 = vector.load %arg7[%c0_10, %c0_11] : memref<1x8xf32, #tpu.memory_space<vmem>>, vector<1x8xf32>
    %14 = vector.broadcast %13 : vector<1x8xf32> to vector<16x8xf32>
    %15 = arith.addf %12, %14 : vector<16x8xf32>
    %cst_12 = arith.constant 0.000000e+00 : f32
    %16 = vector.broadcast %cst_12 : f32 to vector<16x8xf32>
    %17 = arith.maximumf %15, %16 : vector<16x8xf32>
    %c0_13 = arith.constant 0 : index
    %c0_14 = arith.constant 0 : index
    %18 = vector.load %arg3[%c0_13, %c0_14] : memref<16x10xf32, #tpu.memory_space<vmem>>, vector<16x10xf32>
    %c0_15 = arith.constant 0 : index
    %c0_16 = arith.constant 0 : index
    %19 = vector.load %arg8[%c0_15, %c0_16] : memref<10x16xf32, #tpu.memory_space<vmem>>, vector<10x16xf32>
    %cst_17 = arith.constant dense<0.000000e+00> : vector<16x16xf32>
    %20 = tpu.matmul %18, %19, %cst_17 {dimension_numbers = #tpu.dot_dimension_numbers<[1], [0], [0], [1], [0, 0, 1, 1], [], []>} : vector<16x10xf32>, vector<10x16xf32>, vector<16x16xf32> -> vector<16x16xf32>
    %c0_18 = arith.constant 0 : index
    %c0_19 = arith.constant 0 : index
    %21 = vector.load %arg9[%c0_18, %c0_19] : memref<1x16xf32, #tpu.memory_space<vmem>>, vector<1x16xf32>
    %22 = vector.broadcast %21 : vector<1x16xf32> to vector<16x16xf32>
    %23 = arith.addf %20, %22 : vector<16x16xf32>
    %cst_20 = arith.constant 0.000000e+00 : f32
    %24 = vector.broadcast %cst_20 : f32 to vector<16x16xf32>
    %25 = arith.maximumf %23, %24 : vector<16x16xf32>
    %c0_21 = arith.constant 0 : index
    %c0_22 = arith.constant 0 : index
    %26 = vector.load %arg10[%c0_21, %c0_22] : memref<8x32xf32, #tpu.memory_space<vmem>>, vector<8x32xf32>
    %cst_23 = arith.constant dense<0.000000e+00> : vector<16x32xf32>
    %27 = tpu.matmul %7, %26, %cst_23 {dimension_numbers = #tpu.dot_dimension_numbers<[1], [0], [0], [1], [0, 0, 1, 1], [], []>} : vector<16x8xf32>, vector<8x32xf32>, vector<16x32xf32> -> vector<16x32xf32>
    %c0_24 = arith.constant 0 : index
    %c0_25 = arith.constant 0 : index
    %28 = vector.load %arg13[%c0_24, %c0_25] : memref<8x32xf32, #tpu.memory_space<vmem>>, vector<8x32xf32>
    %cst_26 = arith.constant dense<0.000000e+00> : vector<16x32xf32>
    %29 = tpu.matmul %17, %28, %cst_26 {dimension_numbers = #tpu.dot_dimension_numbers<[1], [0], [0], [1], [0, 0, 1, 1], [], []>} : vector<16x8xf32>, vector<8x32xf32>, vector<16x32xf32> -> vector<16x32xf32>
    %30 = arith.addf %27, %29 : vector<16x32xf32>
    %c0_27 = arith.constant 0 : index
    %c0_28 = arith.constant 0 : index
    %31 = vector.load %arg16[%c0_27, %c0_28] : memref<16x32xf32, #tpu.memory_space<vmem>>, vector<16x32xf32>
    %cst_29 = arith.constant dense<0.000000e+00> : vector<16x32xf32>
    %32 = tpu.matmul %25, %31, %cst_29 {dimension_numbers = #tpu.dot_dimension_numbers<[1], [0], [0], [1], [0, 0, 1, 1], [], []>} : vector<16x16xf32>, vector<16x32xf32>, vector<16x32xf32> -> vector<16x32xf32>
    %33 = arith.addf %30, %32 : vector<16x32xf32>
    %c0_30 = arith.constant 0 : index
    %c0_31 = arith.constant 0 : index
    %34 = vector.load %arg19[%c0_30, %c0_31] : memref<1x32xf32, #tpu.memory_space<vmem>>, vector<1x32xf32>
    %35 = vector.broadcast %34 : vector<1x32xf32> to vector<16x32xf32>
    %36 = arith.addf %33, %35 : vector<16x32xf32>
    %c0_32 = arith.constant 0 : index
    %c0_33 = arith.constant 0 : index
    %37 = vector.load %arg33[%c0_32, %c0_33] : memref<16x32xf32, #tpu.memory_space<vmem>>, vector<16x32xf32>
    tpu.vector_store %arg33[%c0_32, %c0_33], %36 {strides = array<i32>} : memref<16x32xf32, #tpu.memory_space<vmem>>, vector<16x32xf32>,
    %c0_34 = arith.constant 0 : index
    %c0_35 = arith.constant 0 : index
    %38 = vector.load %arg11[%c0_34, %c0_35] : memref<8x32xf32, #tpu.memory_space<vmem>>, vector<8x32xf32>
    %cst_36 = arith.constant dense<0.000000e+00> : vector<16x32xf32>
    %39 = tpu.matmul %7, %38, %cst_36 {dimension_numbers = #tpu.dot_dimension_numbers<[1], [0], [0], [1], [0, 0, 1, 1], [], []>} : vector<16x8xf32>, vector<8x32xf32>, vector<16x32xf32> -> vector<16x32xf32>
    %c0_37 = arith.constant 0 : index
    %c0_38 = arith.constant 0 : index
    %40 = vector.load %arg14[%c0_37, %c0_38] : memref<8x32xf32, #tpu.memory_space<vmem>>, vector<8x32xf32>
    %cst_39 = arith.constant dense<0.000000e+00> : vector<16x32xf32>
    %41 = tpu.matmul %17, %40, %cst_39 {dimension_numbers = #tpu.dot_dimension_numbers<[1], [0], [0], [1], [0, 0, 1, 1], [], []>} : vector<16x8xf32>, vector<8x32xf32>, vector<16x32xf32> -> vector<16x32xf32>
    %42 = arith.addf %39, %41 : vector<16x32xf32>
    %c0_40 = arith.constant 0 : index
    %c0_41 = arith.constant 0 : index
    %43 = vector.load %arg17[%c0_40, %c0_41] : memref<16x32xf32, #tpu.memory_space<vmem>>, vector<16x32xf32>
    %cst_42 = arith.constant dense<0.000000e+00> : vector<16x32xf32>
    %44 = tpu.matmul %25, %43, %cst_42 {dimension_numbers = #tpu.dot_dimension_numbers<[1], [0], [0], [1], [0, 0, 1, 1], [], []>} : vector<16x16xf32>, vector<16x32xf32>, vector<16x32xf32> -> vector<16x32xf32>
    %45 = arith.addf %42, %44 : vector<16x32xf32>
    %c0_43 = arith.constant 0 : index
    %c0_44 = arith.constant 0 : index
    %46 = vector.load %arg20[%c0_43, %c0_44] : memref<1x32xf32, #tpu.memory_space<vmem>>, vector<1x32xf32>
    %47 = vector.broadcast %46 : vector<1x32xf32> to vector<16x32xf32>
    %48 = arith.addf %45, %47 : vector<16x32xf32>
    %c0_45 = arith.constant 0 : index
    %c0_46 = arith.constant 0 : index
    %49 = vector.load %arg34[%c0_45, %c0_46] : memref<16x32xf32, #tpu.memory_space<vmem>>, vector<16x32xf32>
    tpu.vector_store %arg34[%c0_45, %c0_46], %48 {strides = array<i32>} : memref<16x32xf32, #tpu.memory_space<vmem>>, vector<16x32xf32>,
    %c0_47 = arith.constant 0 : index
    %c0_48 = arith.constant 0 : index
    %50 = vector.load %arg12[%c0_47, %c0_48] : memref<8x32xf32, #tpu.memory_space<vmem>>, vector<8x32xf32>
    %cst_49 = arith.constant dense<0.000000e+00> : vector<16x32xf32>
    %51 = tpu.matmul %7, %50, %cst_49 {dimension_numbers = #tpu.dot_dimension_numbers<[1], [0], [0], [1], [0, 0, 1, 1], [], []>} : vector<16x8xf32>, vector<8x32xf32>, vector<16x32xf32> -> vector<16x32xf32>
    %c0_50 = arith.constant 0 : index
    %c0_51 = arith.constant 0 : index
    %52 = vector.load %arg15[%c0_50, %c0_51] : memref<8x32xf32, #tpu.memory_space<vmem>>, vector<8x32xf32>
    %cst_52 = arith.constant dense<0.000000e+00> : vector<16x32xf32>
    %53 = tpu.matmul %17, %52, %cst_52 {dimension_numbers = #tpu.dot_dimension_numbers<[1], [0], [0], [1], [0, 0, 1, 1], [], []>} : vector<16x8xf32>, vector<8x32xf32>, vector<16x32xf32> -> vector<16x32xf32>
    %54 = arith.addf %51, %53 : vector<16x32xf32>
    %c0_53 = arith.constant 0 : index
    %c0_54 = arith.constant 0 : index
    %55 = vector.load %arg18[%c0_53, %c0_54] : memref<16x32xf32, #tpu.memory_space<vmem>>, vector<16x32xf32>
    %cst_55 = arith.constant dense<0.000000e+00> : vector<16x32xf32>
    %56 = tpu.matmul %25, %55, %cst_55 {dimension_numbers = #tpu.dot_dimension_numbers<[1], [0], [0], [1], [0, 0, 1, 1], [], []>} : vector<16x16xf32>, vector<16x32xf32>, vector<16x32xf32> -> vector<16x32xf32>
    %57 = arith.addf %54, %56 : vector<16x32xf32>
    %c0_56 = arith.constant 0 : index
    %c0_57 = arith.constant 0 : index
    %58 = vector.load %arg21[%c0_56, %c0_57] : memref<1x32xf32, #tpu.memory_space<vmem>>, vector<1x32xf32>
    %59 = vector.broadcast %58 : vector<1x32xf32> to vector<16x32xf32>
    %60 = arith.addf %57, %59 : vector<16x32xf32>
    %c0_58 = arith.constant 0 : index
    %c0_59 = arith.constant 0 : index
    %61 = vector.load %arg35[%c0_58, %c0_59] : memref<16x32xf32, #tpu.memory_space<vmem>>, vector<16x32xf32>
    tpu.vector_store %arg35[%c0_58, %c0_59], %60 {strides = array<i32>} : memref<16x32xf32, #tpu.memory_space<vmem>>, vector<16x32xf32>,
    %cst_60 = arith.constant 0.000000e+00 : f32
    %62 = vector.broadcast %cst_60 : f32 to vector<2x32xf32>
    %c0_61 = arith.constant 0 : index
    %c0_62 = arith.constant 0 : index
    %63 = vector.load %arg22[%c0_61, %c0_62] : memref<32x32xf32, #tpu.memory_space<vmem>>, vector<32x32xf32>
    %cst_63 = arith.constant dense<0.000000e+00> : vector<2x32xf32>
    %64 = tpu.matmul %62, %63, %cst_63 {dimension_numbers = #tpu.dot_dimension_numbers<[1], [0], [0], [1], [0, 0, 1, 1], [], []>} : vector<2x32xf32>, vector<32x32xf32>, vector<2x32xf32> -> vector<2x32xf32>
    %c0_64 = arith.constant 0 : index
    %c0_65 = arith.constant 0 : index
    %65 = vector.load %arg25[%c0_64, %c0_65] : memref<1x32xf32, #tpu.memory_space<vmem>>, vector<1x32xf32>
    %66 = vector.broadcast %65 : vector<1x32xf32> to vector<2x32xf32>
    %67 = arith.addf %64, %66 : vector<2x32xf32>
    %c0_66 = arith.constant 0 : index
    %c0_67 = arith.constant 0 : index
    %68 = vector.load %arg23[%c0_66, %c0_67] : memref<32x32xf32, #tpu.memory_space<vmem>>, vector<32x32xf32>
    %cst_68 = arith.constant dense<0.000000e+00> : vector<2x32xf32>
    %69 = tpu.matmul %62, %68, %cst_68 {dimension_numbers = #tpu.dot_dimension_numbers<[1], [0], [0], [1], [0, 0, 1, 1], [], []>} : vector<2x32xf32>, vector<32x32xf32>, vector<2x32xf32> -> vector<2x32xf32>
    %c0_69 = arith.constant 0 : index
    %c0_70 = arith.constant 0 : index
    %70 = vector.load %arg26[%c0_69, %c0_70] : memref<1x32xf32, #tpu.memory_space<vmem>>, vector<1x32xf32>
    %71 = vector.broadcast %70 : vector<1x32xf32> to vector<2x32xf32>
    %72 = arith.addf %69, %71 : vector<2x32xf32>
    %c0_71 = arith.constant 0 : index
    %c0_72 = arith.constant 0 : index
    %73 = vector.load %arg24[%c0_71, %c0_72] : memref<32x32xf32, #tpu.memory_space<vmem>>, vector<32x32xf32>
    %cst_73 = arith.constant dense<0.000000e+00> : vector<2x32xf32>
    %74 = tpu.matmul %62, %73, %cst_73 {dimension_numbers = #tpu.dot_dimension_numbers<[1], [0], [0], [1], [0, 0, 1, 1], [], []>} : vector<2x32xf32>, vector<32x32xf32>, vector<2x32xf32> -> vector<2x32xf32>
    %c0_74 = arith.constant 0 : index
    %c0_75 = arith.constant 0 : index
    %75 = vector.load %arg27[%c0_74, %c0_75] : memref<1x32xf32, #tpu.memory_space<vmem>>, vector<1x32xf32>
    %76 = vector.broadcast %75 : vector<1x32xf32> to vector<2x32xf32>
    %77 = arith.addf %74, %76 : vector<2x32xf32>
    %c0_76 = arith.constant 0 : index
    %c0_77 = arith.constant 0 : index
    %78 = vector.load %arg33[%c0_76, %c0_77] : memref<16x32xf32, #tpu.memory_space<vmem>>, vector<2x32xf32>
    %79 = arith.addf %78, %67 : vector<2x32xf32>
    %80 = arith.negf %79 : vector<2x32xf32>
    %81 = math.exp %80 : vector<2x32xf32>
    %cst_78 = arith.constant 1.000000e+00 : f32
    %82 = vector.broadcast %cst_78 : f32 to vector<2x32xf32>
    %83 = arith.addf %82, %81 : vector<2x32xf32>
    %84 = arith.divf %82, %83 : vector<2x32xf32>
    %c0_79 = arith.constant 0 : index
    %c0_80 = arith.constant 0 : index
    %85 = vector.load %arg34[%c0_79, %c0_80] : memref<16x32xf32, #tpu.memory_space<vmem>>, vector<2x32xf32>
    %86 = arith.addf %85, %72 : vector<2x32xf32>
    %87 = arith.negf %86 : vector<2x32xf32>
    %88 = math.exp %87 : vector<2x32xf32>
    %cst_81 = arith.constant 1.000000e+00 : f32
    %89 = vector.broadcast %cst_81 : f32 to vector<2x32xf32>
    %90 = arith.addf %89, %88 : vector<2x32xf32>
    %91 = arith.divf %89, %90 : vector<2x32xf32>
    %c0_82 = arith.constant 0 : index
    %c0_83 = arith.constant 0 : index
    %92 = vector.load %arg35[%c0_82, %c0_83] : memref<16x32xf32, #tpu.memory_space<vmem>>, vector<2x32xf32>
    %93 = arith.mulf %84, %77 : vector<2x32xf32>
    %94 = arith.addf %92, %93 : vector<2x32xf32>
    %95 = math.tanh %94 : vector<2x32xf32>
    %cst_84 = arith.constant 1.000000e+00 : f32
    %96 = vector.broadcast %cst_84 : f32 to vector<2x32xf32>
    %97 = arith.subf %96, %91 : vector<2x32xf32>
    %98 = arith.mulf %97, %95 : vector<2x32xf32>
    %99 = arith.mulf %91, %62 : vector<2x32xf32>
    %100 = arith.addf %98, %99 : vector<2x32xf32>
    %c0_85 = arith.constant 0 : index
    %c0_86 = arith.constant 0 : index
    %101 = vector.load %arg36[%c0_85, %c0_86] : memref<16x32xf32, #tpu.memory_space<vmem>>, vector<2x32xf32>
    tpu.vector_store %arg36[%c0_85, %c0_86], %100 {strides = array<i32>} : memref<16x32xf32, #tpu.memory_space<vmem>>, vector<2x32xf32>,
    %c0_87 = arith.constant 0 : index
    %c0_88 = arith.constant 0 : index
    %102 = vector.load %arg22[%c0_87, %c0_88] : memref<32x32xf32, #tpu.memory_space<vmem>>, vector<32x32xf32>
    %cst_89 = arith.constant dense<0.000000e+00> : vector<2x32xf32>
    %103 = tpu.matmul %100, %102, %cst_89 {dimension_numbers = #tpu.dot_dimension_numbers<[1], [0], [0], [1], [0, 0, 1, 1], [], []>} : vector<2x32xf32>, vector<32x32xf32>, vector<2x32xf32> -> vector<2x32xf32>
    %c0_90 = arith.constant 0 : index
    %c0_91 = arith.constant 0 : index
    %104 = vector.load %arg25[%c0_90, %c0_91] : memref<1x32xf32, #tpu.memory_space<vmem>>, vector<1x32xf32>
    %105 = vector.broadcast %104 : vector<1x32xf32> to vector<2x32xf32>
    %106 = arith.addf %103, %105 : vector<2x32xf32>
    %c0_92 = arith.constant 0 : index
    %c0_93 = arith.constant 0 : index
    %107 = vector.load %arg23[%c0_92, %c0_93] : memref<32x32xf32, #tpu.memory_space<vmem>>, vector<32x32xf32>
    %cst_94 = arith.constant dense<0.000000e+00> : vector<2x32xf32>
    %108 = tpu.matmul %100, %107, %cst_94 {dimension_numbers = #tpu.dot_dimension_numbers<[1], [0], [0], [1], [0, 0, 1, 1], [], []>} : vector<2x32xf32>, vector<32x32xf32>, vector<2x32xf32> -> vector<2x32xf32>
    %c0_95 = arith.constant 0 : index
    %c0_96 = arith.constant 0 : index
    %109 = vector.load %arg26[%c0_95, %c0_96] : memref<1x32xf32, #tpu.memory_space<vmem>>, vector<1x32xf32>
    %110 = vector.broadcast %109 : vector<1x32xf32> to vector<2x32xf32>
    %111 = arith.addf %108, %110 : vector<2x32xf32>
    %c0_97 = arith.constant 0 : index
    %c0_98 = arith.constant 0 : index
    %112 = vector.load %arg24[%c0_97, %c0_98] : memref<32x32xf32, #tpu.memory_space<vmem>>, vector<32x32xf32>
    %cst_99 = arith.constant dense<0.000000e+00> : vector<2x32xf32>
    %113 = tpu.matmul %100, %112, %cst_99 {dimension_numbers = #tpu.dot_dimension_numbers<[1], [0], [0], [1], [0, 0, 1, 1], [], []>} : vector<2x32xf32>, vector<32x32xf32>, vector<2x32xf32> -> vector<2x32xf32>
    %c0_100 = arith.constant 0 : index
    %c0_101 = arith.constant 0 : index
    %114 = vector.load %arg27[%c0_100, %c0_101] : memref<1x32xf32, #tpu.memory_space<vmem>>, vector<1x32xf32>
    %115 = vector.broadcast %114 : vector<1x32xf32> to vector<2x32xf32>
    %116 = arith.addf %113, %115 : vector<2x32xf32>
    %c2 = arith.constant 2 : index
    %c0_102 = arith.constant 0 : index
    %117 = vector.load %arg33[%c2, %c0_102] : memref<16x32xf32, #tpu.memory_space<vmem>>, vector<2x32xf32>
    %118 = arith.addf %117, %106 : vector<2x32xf32>
    %119 = arith.negf %118 : vector<2x32xf32>
    %120 = math.exp %119 : vector<2x32xf32>
    %cst_103 = arith.constant 1.000000e+00 : f32
    %121 = vector.broadcast %cst_103 : f32 to vector<2x32xf32>
    %122 = arith.addf %121, %120 : vector<2x32xf32>
    %123 = arith.divf %121, %122 : vector<2x32xf32>
    %c2_104 = arith.constant 2 : index
    %c0_105 = arith.constant 0 : index
    %124 = vector.load %arg34[%c2_104, %c0_105] : memref<16x32xf32, #tpu.memory_space<vmem>>, vector<2x32xf32>
    %125 = arith.addf %124, %111 : vector<2x32xf32>
    %126 = arith.negf %125 : vector<2x32xf32>
    %127 = math.exp %126 : vector<2x32xf32>
    %cst_106 = arith.constant 1.000000e+00 : f32
    %128 = vector.broadcast %cst_106 : f32 to vector<2x32xf32>
    %129 = arith.addf %128, %127 : vector<2x32xf32>
    %130 = arith.divf %128, %129 : vector<2x32xf32>
    %c2_107 = arith.constant 2 : index
    %c0_108 = arith.constant 0 : index
    %131 = vector.load %arg35[%c2_107, %c0_108] : memref<16x32xf32, #tpu.memory_space<vmem>>, vector<2x32xf32>
    %132 = arith.mulf %123, %116 : vector<2x32xf32>
    %133 = arith.addf %131, %132 : vector<2x32xf32>
    %134 = math.tanh %133 : vector<2x32xf32>
    %cst_109 = arith.constant 1.000000e+00 : f32
    %135 = vector.broadcast %cst_109 : f32 to vector<2x32xf32>
    %136 = arith.subf %135, %130 : vector<2x32xf32>
    %137 = arith.mulf %136, %134 : vector<2x32xf32>
    %138 = arith.mulf %130, %100 : vector<2x32xf32>
    %139 = arith.addf %137, %138 : vector<2x32xf32>
    %c2_110 = arith.constant 2 : index
    %c0_111 = arith.constant 0 : index
    %140 = vector.load %arg36[%c2_110, %c0_111] : memref<16x32xf32, #tpu.memory_space<vmem>>, vector<2x32xf32>
    tpu.vector_store %arg36[%c2_110, %c0_111], %139 {strides = array<i32>} : memref<16x32xf32, #tpu.memory_space<vmem>>, vector<2x32xf32>,
    %c0_112 = arith.constant 0 : index
    %c0_113 = arith.constant 0 : index
    %141 = vector.load %arg22[%c0_112, %c0_113] : memref<32x32xf32, #tpu.memory_space<vmem>>, vector<32x32xf32>
    %cst_114 = arith.constant dense<0.000000e+00> : vector<2x32xf32>
    %142 = tpu.matmul %139, %141, %cst_114 {dimension_numbers = #tpu.dot_dimension_numbers<[1], [0], [0], [1], [0, 0, 1, 1], [], []>} : vector<2x32xf32>, vector<32x32xf32>, vector<2x32xf32> -> vector<2x32xf32>
    %c0_115 = arith.constant 0 : index
    %c0_116 = arith.constant 0 : index
    %143 = vector.load %arg25[%c0_115, %c0_116] : memref<1x32xf32, #tpu.memory_space<vmem>>, vector<1x32xf32>
    %144 = vector.broadcast %143 : vector<1x32xf32> to vector<2x32xf32>
    %145 = arith.addf %142, %144 : vector<2x32xf32>
    %c0_117 = arith.constant 0 : index
    %c0_118 = arith.constant 0 : index
    %146 = vector.load %arg23[%c0_117, %c0_118] : memref<32x32xf32, #tpu.memory_space<vmem>>, vector<32x32xf32>
    %cst_119 = arith.constant dense<0.000000e+00> : vector<2x32xf32>
    %147 = tpu.matmul %139, %146, %cst_119 {dimension_numbers = #tpu.dot_dimension_numbers<[1], [0], [0], [1], [0, 0, 1, 1], [], []>} : vector<2x32xf32>, vector<32x32xf32>, vector<2x32xf32> -> vector<2x32xf32>
    %c0_120 = arith.constant 0 : index
    %c0_121 = arith.constant 0 : index
    %148 = vector.load %arg26[%c0_120, %c0_121] : memref<1x32xf32, #tpu.memory_space<vmem>>, vector<1x32xf32>
    %149 = vector.broadcast %148 : vector<1x32xf32> to vector<2x32xf32>
    %150 = arith.addf %147, %149 : vector<2x32xf32>
    %c0_122 = arith.constant 0 : index
    %c0_123 = arith.constant 0 : index
    %151 = vector.load %arg24[%c0_122, %c0_123] : memref<32x32xf32, #tpu.memory_space<vmem>>, vector<32x32xf32>
    %cst_124 = arith.constant dense<0.000000e+00> : vector<2x32xf32>
    %152 = tpu.matmul %139, %151, %cst_124 {dimension_numbers = #tpu.dot_dimension_numbers<[1], [0], [0], [1], [0, 0, 1, 1], [], []>} : vector<2x32xf32>, vector<32x32xf32>, vector<2x32xf32> -> vector<2x32xf32>
    %c0_125 = arith.constant 0 : index
    %c0_126 = arith.constant 0 : index
    %153 = vector.load %arg27[%c0_125, %c0_126] : memref<1x32xf32, #tpu.memory_space<vmem>>, vector<1x32xf32>
    %154 = vector.broadcast %153 : vector<1x32xf32> to vector<2x32xf32>
    %155 = arith.addf %152, %154 : vector<2x32xf32>
    %c4 = arith.constant 4 : index
    %c0_127 = arith.constant 0 : index
    %156 = vector.load %arg33[%c4, %c0_127] : memref<16x32xf32, #tpu.memory_space<vmem>>, vector<2x32xf32>
    %157 = arith.addf %156, %145 : vector<2x32xf32>
    %158 = arith.negf %157 : vector<2x32xf32>
    %159 = math.exp %158 : vector<2x32xf32>
    %cst_128 = arith.constant 1.000000e+00 : f32
    %160 = vector.broadcast %cst_128 : f32 to vector<2x32xf32>
    %161 = arith.addf %160, %159 : vector<2x32xf32>
    %162 = arith.divf %160, %161 : vector<2x32xf32>
    %c4_129 = arith.constant 4 : index
    %c0_130 = arith.constant 0 : index
    %163 = vector.load %arg34[%c4_129, %c0_130] : memref<16x32xf32, #tpu.memory_space<vmem>>, vector<2x32xf32>
    %164 = arith.addf %163, %150 : vector<2x32xf32>
    %165 = arith.negf %164 : vector<2x32xf32>
    %166 = math.exp %165 : vector<2x32xf32>
    %cst_131 = arith.constant 1.000000e+00 : f32
    %167 = vector.broadcast %cst_131 : f32 to vector<2x32xf32>
    %168 = arith.addf %167, %166 : vector<2x32xf32>
    %169 = arith.divf %167, %168 : vector<2x32xf32>
    %c4_132 = arith.constant 4 : index
    %c0_133 = arith.constant 0 : index
    %170 = vector.load %arg35[%c4_132, %c0_133] : memref<16x32xf32, #tpu.memory_space<vmem>>, vector<2x32xf32>
    %171 = arith.mulf %162, %155 : vector<2x32xf32>
    %172 = arith.addf %170, %171 : vector<2x32xf32>
    %173 = math.tanh %172 : vector<2x32xf32>
    %cst_134 = arith.constant 1.000000e+00 : f32
    %174 = vector.broadcast %cst_134 : f32 to vector<2x32xf32>
    %175 = arith.subf %174, %169 : vector<2x32xf32>
    %176 = arith.mulf %175, %173 : vector<2x32xf32>
    %177 = arith.mulf %169, %139 : vector<2x32xf32>
    %178 = arith.addf %176, %177 : vector<2x32xf32>
    %c4_135 = arith.constant 4 : index
    %c0_136 = arith.constant 0 : index
    %179 = vector.load %arg36[%c4_135, %c0_136] : memref<16x32xf32, #tpu.memory_space<vmem>>, vector<2x32xf32>
    tpu.vector_store %arg36[%c4_135, %c0_136], %178 {strides = array<i32>} : memref<16x32xf32, #tpu.memory_space<vmem>>, vector<2x32xf32>,
    %c0_137 = arith.constant 0 : index
    %c0_138 = arith.constant 0 : index
    %180 = vector.load %arg22[%c0_137, %c0_138] : memref<32x32xf32, #tpu.memory_space<vmem>>, vector<32x32xf32>
    %cst_139 = arith.constant dense<0.000000e+00> : vector<2x32xf32>
    %181 = tpu.matmul %178, %180, %cst_139 {dimension_numbers = #tpu.dot_dimension_numbers<[1], [0], [0], [1], [0, 0, 1, 1], [], []>} : vector<2x32xf32>, vector<32x32xf32>, vector<2x32xf32> -> vector<2x32xf32>
    %c0_140 = arith.constant 0 : index
    %c0_141 = arith.constant 0 : index
    %182 = vector.load %arg25[%c0_140, %c0_141] : memref<1x32xf32, #tpu.memory_space<vmem>>, vector<1x32xf32>
    %183 = vector.broadcast %182 : vector<1x32xf32> to vector<2x32xf32>
    %184 = arith.addf %181, %183 : vector<2x32xf32>
    %c0_142 = arith.constant 0 : index
    %c0_143 = arith.constant 0 : index
    %185 = vector.load %arg23[%c0_142, %c0_143] : memref<32x32xf32, #tpu.memory_space<vmem>>, vector<32x32xf32>
    %cst_144 = arith.constant dense<0.000000e+00> : vector<2x32xf32>
    %186 = tpu.matmul %178, %185, %cst_144 {dimension_numbers = #tpu.dot_dimension_numbers<[1], [0], [0], [1], [0, 0, 1, 1], [], []>} : vector<2x32xf32>, vector<32x32xf32>, vector<2x32xf32> -> vector<2x32xf32>
    %c0_145 = arith.constant 0 : index
    %c0_146 = arith.constant 0 : index
    %187 = vector.load %arg26[%c0_145, %c0_146] : memref<1x32xf32, #tpu.memory_space<vmem>>, vector<1x32xf32>
    %188 = vector.broadcast %187 : vector<1x32xf32> to vector<2x32xf32>
    %189 = arith.addf %186, %188 : vector<2x32xf32>
    %c0_147 = arith.constant 0 : index
    %c0_148 = arith.constant 0 : index
    %190 = vector.load %arg24[%c0_147, %c0_148] : memref<32x32xf32, #tpu.memory_space<vmem>>, vector<32x32xf32>
    %cst_149 = arith.constant dense<0.000000e+00> : vector<2x32xf32>
    %191 = tpu.matmul %178, %190, %cst_149 {dimension_numbers = #tpu.dot_dimension_numbers<[1], [0], [0], [1], [0, 0, 1, 1], [], []>} : vector<2x32xf32>, vector<32x32xf32>, vector<2x32xf32> -> vector<2x32xf32>
    %c0_150 = arith.constant 0 : index
    %c0_151 = arith.constant 0 : index
    %192 = vector.load %arg27[%c0_150, %c0_151] : memref<1x32xf32, #tpu.memory_space<vmem>>, vector<1x32xf32>
    %193 = vector.broadcast %192 : vector<1x32xf32> to vector<2x32xf32>
    %194 = arith.addf %191, %193 : vector<2x32xf32>
    %c6 = arith.constant 6 : index
    %c0_152 = arith.constant 0 : index
    %195 = vector.load %arg33[%c6, %c0_152] : memref<16x32xf32, #tpu.memory_space<vmem>>, vector<2x32xf32>
    %196 = arith.addf %195, %184 : vector<2x32xf32>
    %197 = arith.negf %196 : vector<2x32xf32>
    %198 = math.exp %197 : vector<2x32xf32>
    %cst_153 = arith.constant 1.000000e+00 : f32
    %199 = vector.broadcast %cst_153 : f32 to vector<2x32xf32>
    %200 = arith.addf %199, %198 : vector<2x32xf32>
    %201 = arith.divf %199, %200 : vector<2x32xf32>
    %c6_154 = arith.constant 6 : index
    %c0_155 = arith.constant 0 : index
    %202 = vector.load %arg34[%c6_154, %c0_155] : memref<16x32xf32, #tpu.memory_space<vmem>>, vector<2x32xf32>
    %203 = arith.addf %202, %189 : vector<2x32xf32>
    %204 = arith.negf %203 : vector<2x32xf32>
    %205 = math.exp %204 : vector<2x32xf32>
    %cst_156 = arith.constant 1.000000e+00 : f32
    %206 = vector.broadcast %cst_156 : f32 to vector<2x32xf32>
    %207 = arith.addf %206, %205 : vector<2x32xf32>
    %208 = arith.divf %206, %207 : vector<2x32xf32>
    %c6_157 = arith.constant 6 : index
    %c0_158 = arith.constant 0 : index
    %209 = vector.load %arg35[%c6_157, %c0_158] : memref<16x32xf32, #tpu.memory_space<vmem>>, vector<2x32xf32>
    %210 = arith.mulf %201, %194 : vector<2x32xf32>
    %211 = arith.addf %209, %210 : vector<2x32xf32>
    %212 = math.tanh %211 : vector<2x32xf32>
    %cst_159 = arith.constant 1.000000e+00 : f32
    %213 = vector.broadcast %cst_159 : f32 to vector<2x32xf32>
    %214 = arith.subf %213, %208 : vector<2x32xf32>
    %215 = arith.mulf %214, %212 : vector<2x32xf32>
    %216 = arith.mulf %208, %178 : vector<2x32xf32>
    %217 = arith.addf %215, %216 : vector<2x32xf32>
    %c6_160 = arith.constant 6 : index
    %c0_161 = arith.constant 0 : index
    %218 = vector.load %arg36[%c6_160, %c0_161] : memref<16x32xf32, #tpu.memory_space<vmem>>, vector<2x32xf32>
    tpu.vector_store %arg36[%c6_160, %c0_161], %217 {strides = array<i32>} : memref<16x32xf32, #tpu.memory_space<vmem>>, vector<2x32xf32>,
    %c0_162 = arith.constant 0 : index
    %c0_163 = arith.constant 0 : index
    %219 = vector.load %arg22[%c0_162, %c0_163] : memref<32x32xf32, #tpu.memory_space<vmem>>, vector<32x32xf32>
    %cst_164 = arith.constant dense<0.000000e+00> : vector<2x32xf32>
    %220 = tpu.matmul %217, %219, %cst_164 {dimension_numbers = #tpu.dot_dimension_numbers<[1], [0], [0], [1], [0, 0, 1, 1], [], []>} : vector<2x32xf32>, vector<32x32xf32>, vector<2x32xf32> -> vector<2x32xf32>
    %c0_165 = arith.constant 0 : index
    %c0_166 = arith.constant 0 : index
    %221 = vector.load %arg25[%c0_165, %c0_166] : memref<1x32xf32, #tpu.memory_space<vmem>>, vector<1x32xf32>
    %222 = vector.broadcast %221 : vector<1x32xf32> to vector<2x32xf32>
    %223 = arith.addf %220, %222 : vector<2x32xf32>
    %c0_167 = arith.constant 0 : index
    %c0_168 = arith.constant 0 : index
    %224 = vector.load %arg23[%c0_167, %c0_168] : memref<32x32xf32, #tpu.memory_space<vmem>>, vector<32x32xf32>
    %cst_169 = arith.constant dense<0.000000e+00> : vector<2x32xf32>
    %225 = tpu.matmul %217, %224, %cst_169 {dimension_numbers = #tpu.dot_dimension_numbers<[1], [0], [0], [1], [0, 0, 1, 1], [], []>} : vector<2x32xf32>, vector<32x32xf32>, vector<2x32xf32> -> vector<2x32xf32>
    %c0_170 = arith.constant 0 : index
    %c0_171 = arith.constant 0 : index
    %226 = vector.load %arg26[%c0_170, %c0_171] : memref<1x32xf32, #tpu.memory_space<vmem>>, vector<1x32xf32>
    %227 = vector.broadcast %226 : vector<1x32xf32> to vector<2x32xf32>
    %228 = arith.addf %225, %227 : vector<2x32xf32>
    %c0_172 = arith.constant 0 : index
    %c0_173 = arith.constant 0 : index
    %229 = vector.load %arg24[%c0_172, %c0_173] : memref<32x32xf32, #tpu.memory_space<vmem>>, vector<32x32xf32>
    %cst_174 = arith.constant dense<0.000000e+00> : vector<2x32xf32>
    %230 = tpu.matmul %217, %229, %cst_174 {dimension_numbers = #tpu.dot_dimension_numbers<[1], [0], [0], [1], [0, 0, 1, 1], [], []>} : vector<2x32xf32>, vector<32x32xf32>, vector<2x32xf32> -> vector<2x32xf32>
    %c0_175 = arith.constant 0 : index
    %c0_176 = arith.constant 0 : index
    %231 = vector.load %arg27[%c0_175, %c0_176] : memref<1x32xf32, #tpu.memory_space<vmem>>, vector<1x32xf32>
    %232 = vector.broadcast %231 : vector<1x32xf32> to vector<2x32xf32>
    %233 = arith.addf %230, %232 : vector<2x32xf32>
    %c8 = arith.constant 8 : index
    %c0_177 = arith.constant 0 : index
    %234 = vector.load %arg33[%c8, %c0_177] : memref<16x32xf32, #tpu.memory_space<vmem>>, vector<2x32xf32>
    %235 = arith.addf %234, %223 : vector<2x32xf32>
    %236 = arith.negf %235 : vector<2x32xf32>
    %237 = math.exp %236 : vector<2x32xf32>
    %cst_178 = arith.constant 1.000000e+00 : f32
    %238 = vector.broadcast %cst_178 : f32 to vector<2x32xf32>
    %239 = arith.addf %238, %237 : vector<2x32xf32>
    %240 = arith.divf %238, %239 : vector<2x32xf32>
    %c8_179 = arith.constant 8 : index
    %c0_180 = arith.constant 0 : index
    %241 = vector.load %arg34[%c8_179, %c0_180] : memref<16x32xf32, #tpu.memory_space<vmem>>, vector<2x32xf32>
    %242 = arith.addf %241, %228 : vector<2x32xf32>
    %243 = arith.negf %242 : vector<2x32xf32>
    %244 = math.exp %243 : vector<2x32xf32>
    %cst_181 = arith.constant 1.000000e+00 : f32
    %245 = vector.broadcast %cst_181 : f32 to vector<2x32xf32>
    %246 = arith.addf %245, %244 : vector<2x32xf32>
    %247 = arith.divf %245, %246 : vector<2x32xf32>
    %c8_182 = arith.constant 8 : index
    %c0_183 = arith.constant 0 : index
    %248 = vector.load %arg35[%c8_182, %c0_183] : memref<16x32xf32, #tpu.memory_space<vmem>>, vector<2x32xf32>
    %249 = arith.mulf %240, %233 : vector<2x32xf32>
    %250 = arith.addf %248, %249 : vector<2x32xf32>
    %251 = math.tanh %250 : vector<2x32xf32>
    %cst_184 = arith.constant 1.000000e+00 : f32
    %252 = vector.broadcast %cst_184 : f32 to vector<2x32xf32>
    %253 = arith.subf %252, %247 : vector<2x32xf32>
    %254 = arith.mulf %253, %251 : vector<2x32xf32>
    %255 = arith.mulf %247, %217 : vector<2x32xf32>
    %256 = arith.addf %254, %255 : vector<2x32xf32>
    %c8_185 = arith.constant 8 : index
    %c0_186 = arith.constant 0 : index
    %257 = vector.load %arg36[%c8_185, %c0_186] : memref<16x32xf32, #tpu.memory_space<vmem>>, vector<2x32xf32>
    tpu.vector_store %arg36[%c8_185, %c0_186], %256 {strides = array<i32>} : memref<16x32xf32, #tpu.memory_space<vmem>>, vector<2x32xf32>,
    %c0_187 = arith.constant 0 : index
    %c0_188 = arith.constant 0 : index
    %258 = vector.load %arg22[%c0_187, %c0_188] : memref<32x32xf32, #tpu.memory_space<vmem>>, vector<32x32xf32>
    %cst_189 = arith.constant dense<0.000000e+00> : vector<2x32xf32>
    %259 = tpu.matmul %256, %258, %cst_189 {dimension_numbers = #tpu.dot_dimension_numbers<[1], [0], [0], [1], [0, 0, 1, 1], [], []>} : vector<2x32xf32>, vector<32x32xf32>, vector<2x32xf32> -> vector<2x32xf32>
    %c0_190 = arith.constant 0 : index
    %c0_191 = arith.constant 0 : index
    %260 = vector.load %arg25[%c0_190, %c0_191] : memref<1x32xf32, #tpu.memory_space<vmem>>, vector<1x32xf32>
    %261 = vector.broadcast %260 : vector<1x32xf32> to vector<2x32xf32>
    %262 = arith.addf %259, %261 : vector<2x32xf32>
    %c0_192 = arith.constant 0 : index
    %c0_193 = arith.constant 0 : index
    %263 = vector.load %arg23[%c0_192, %c0_193] : memref<32x32xf32, #tpu.memory_space<vmem>>, vector<32x32xf32>
    %cst_194 = arith.constant dense<0.000000e+00> : vector<2x32xf32>
    %264 = tpu.matmul %256, %263, %cst_194 {dimension_numbers = #tpu.dot_dimension_numbers<[1], [0], [0], [1], [0, 0, 1, 1], [], []>} : vector<2x32xf32>, vector<32x32xf32>, vector<2x32xf32> -> vector<2x32xf32>
    %c0_195 = arith.constant 0 : index
    %c0_196 = arith.constant 0 : index
    %265 = vector.load %arg26[%c0_195, %c0_196] : memref<1x32xf32, #tpu.memory_space<vmem>>, vector<1x32xf32>
    %266 = vector.broadcast %265 : vector<1x32xf32> to vector<2x32xf32>
    %267 = arith.addf %264, %266 : vector<2x32xf32>
    %c0_197 = arith.constant 0 : index
    %c0_198 = arith.constant 0 : index
    %268 = vector.load %arg24[%c0_197, %c0_198] : memref<32x32xf32, #tpu.memory_space<vmem>>, vector<32x32xf32>
    %cst_199 = arith.constant dense<0.000000e+00> : vector<2x32xf32>
    %269 = tpu.matmul %256, %268, %cst_199 {dimension_numbers = #tpu.dot_dimension_numbers<[1], [0], [0], [1], [0, 0, 1, 1], [], []>} : vector<2x32xf32>, vector<32x32xf32>, vector<2x32xf32> -> vector<2x32xf32>
    %c0_200 = arith.constant 0 : index
    %c0_201 = arith.constant 0 : index
    %270 = vector.load %arg27[%c0_200, %c0_201] : memref<1x32xf32, #tpu.memory_space<vmem>>, vector<1x32xf32>
    %271 = vector.broadcast %270 : vector<1x32xf32> to vector<2x32xf32>
    %272 = arith.addf %269, %271 : vector<2x32xf32>
    %c10 = arith.constant 10 : index
    %c0_202 = arith.constant 0 : index
    %273 = vector.load %arg33[%c10, %c0_202] : memref<16x32xf32, #tpu.memory_space<vmem>>, vector<2x32xf32>
    %274 = arith.addf %273, %262 : vector<2x32xf32>
    %275 = arith.negf %274 : vector<2x32xf32>
    %276 = math.exp %275 : vector<2x32xf32>
    %cst_203 = arith.constant 1.000000e+00 : f32
    %277 = vector.broadcast %cst_203 : f32 to vector<2x32xf32>
    %278 = arith.addf %277, %276 : vector<2x32xf32>
    %279 = arith.divf %277, %278 : vector<2x32xf32>
    %c10_204 = arith.constant 10 : index
    %c0_205 = arith.constant 0 : index
    %280 = vector.load %arg34[%c10_204, %c0_205] : memref<16x32xf32, #tpu.memory_space<vmem>>, vector<2x32xf32>
    %281 = arith.addf %280, %267 : vector<2x32xf32>
    %282 = arith.negf %281 : vector<2x32xf32>
    %283 = math.exp %282 : vector<2x32xf32>
    %cst_206 = arith.constant 1.000000e+00 : f32
    %284 = vector.broadcast %cst_206 : f32 to vector<2x32xf32>
    %285 = arith.addf %284, %283 : vector<2x32xf32>
    %286 = arith.divf %284, %285 : vector<2x32xf32>
    %c10_207 = arith.constant 10 : index
    %c0_208 = arith.constant 0 : index
    %287 = vector.load %arg35[%c10_207, %c0_208] : memref<16x32xf32, #tpu.memory_space<vmem>>, vector<2x32xf32>
    %288 = arith.mulf %279, %272 : vector<2x32xf32>
    %289 = arith.addf %287, %288 : vector<2x32xf32>
    %290 = math.tanh %289 : vector<2x32xf32>
    %cst_209 = arith.constant 1.000000e+00 : f32
    %291 = vector.broadcast %cst_209 : f32 to vector<2x32xf32>
    %292 = arith.subf %291, %286 : vector<2x32xf32>
    %293 = arith.mulf %292, %290 : vector<2x32xf32>
    %294 = arith.mulf %286, %256 : vector<2x32xf32>
    %295 = arith.addf %293, %294 : vector<2x32xf32>
    %c10_210 = arith.constant 10 : index
    %c0_211 = arith.constant 0 : index
    %296 = vector.load %arg36[%c10_210, %c0_211] : memref<16x32xf32, #tpu.memory_space<vmem>>, vector<2x32xf32>
    tpu.vector_store %arg36[%c10_210, %c0_211], %295 {strides = array<i32>} : memref<16x32xf32, #tpu.memory_space<vmem>>, vector<2x32xf32>,
    %c0_212 = arith.constant 0 : index
    %c0_213 = arith.constant 0 : index
    %297 = vector.load %arg22[%c0_212, %c0_213] : memref<32x32xf32, #tpu.memory_space<vmem>>, vector<32x32xf32>
    %cst_214 = arith.constant dense<0.000000e+00> : vector<2x32xf32>
    %298 = tpu.matmul %295, %297, %cst_214 {dimension_numbers = #tpu.dot_dimension_numbers<[1], [0], [0], [1], [0, 0, 1, 1], [], []>} : vector<2x32xf32>, vector<32x32xf32>, vector<2x32xf32> -> vector<2x32xf32>
    %c0_215 = arith.constant 0 : index
    %c0_216 = arith.constant 0 : index
    %299 = vector.load %arg25[%c0_215, %c0_216] : memref<1x32xf32, #tpu.memory_space<vmem>>, vector<1x32xf32>
    %300 = vector.broadcast %299 : vector<1x32xf32> to vector<2x32xf32>
    %301 = arith.addf %298, %300 : vector<2x32xf32>
    %c0_217 = arith.constant 0 : index
    %c0_218 = arith.constant 0 : index
    %302 = vector.load %arg23[%c0_217, %c0_218] : memref<32x32xf32, #tpu.memory_space<vmem>>, vector<32x32xf32>
    %cst_219 = arith.constant dense<0.000000e+00> : vector<2x32xf32>
    %303 = tpu.matmul %295, %302, %cst_219 {dimension_numbers = #tpu.dot_dimension_numbers<[1], [0], [0], [1], [0, 0, 1, 1], [], []>} : vector<2x32xf32>, vector<32x32xf32>, vector<2x32xf32> -> vector<2x32xf32>
    %c0_220 = arith.constant 0 : index
    %c0_221 = arith.constant 0 : index
    %304 = vector.load %arg26[%c0_220, %c0_221] : memref<1x32xf32, #tpu.memory_space<vmem>>, vector<1x32xf32>
    %305 = vector.broadcast %304 : vector<1x32xf32> to vector<2x32xf32>
    %306 = arith.addf %303, %305 : vector<2x32xf32>
    %c0_222 = arith.constant 0 : index
    %c0_223 = arith.constant 0 : index
    %307 = vector.load %arg24[%c0_222, %c0_223] : memref<32x32xf32, #tpu.memory_space<vmem>>, vector<32x32xf32>
    %cst_224 = arith.constant dense<0.000000e+00> : vector<2x32xf32>
    %308 = tpu.matmul %295, %307, %cst_224 {dimension_numbers = #tpu.dot_dimension_numbers<[1], [0], [0], [1], [0, 0, 1, 1], [], []>} : vector<2x32xf32>, vector<32x32xf32>, vector<2x32xf32> -> vector<2x32xf32>
    %c0_225 = arith.constant 0 : index
    %c0_226 = arith.constant 0 : index
    %309 = vector.load %arg27[%c0_225, %c0_226] : memref<1x32xf32, #tpu.memory_space<vmem>>, vector<1x32xf32>
    %310 = vector.broadcast %309 : vector<1x32xf32> to vector<2x32xf32>
    %311 = arith.addf %308, %310 : vector<2x32xf32>
    %c12 = arith.constant 12 : index
    %c0_227 = arith.constant 0 : index
    %312 = vector.load %arg33[%c12, %c0_227] : memref<16x32xf32, #tpu.memory_space<vmem>>, vector<2x32xf32>
    %313 = arith.addf %312, %301 : vector<2x32xf32>
    %314 = arith.negf %313 : vector<2x32xf32>
    %315 = math.exp %314 : vector<2x32xf32>
    %cst_228 = arith.constant 1.000000e+00 : f32
    %316 = vector.broadcast %cst_228 : f32 to vector<2x32xf32>
    %317 = arith.addf %316, %315 : vector<2x32xf32>
    %318 = arith.divf %316, %317 : vector<2x32xf32>
    %c12_229 = arith.constant 12 : index
    %c0_230 = arith.constant 0 : index
    %319 = vector.load %arg34[%c12_229, %c0_230] : memref<16x32xf32, #tpu.memory_space<vmem>>, vector<2x32xf32>
    %320 = arith.addf %319, %306 : vector<2x32xf32>
    %321 = arith.negf %320 : vector<2x32xf32>
    %322 = math.exp %321 : vector<2x32xf32>
    %cst_231 = arith.constant 1.000000e+00 : f32
    %323 = vector.broadcast %cst_231 : f32 to vector<2x32xf32>
    %324 = arith.addf %323, %322 : vector<2x32xf32>
    %325 = arith.divf %323, %324 : vector<2x32xf32>
    %c12_232 = arith.constant 12 : index
    %c0_233 = arith.constant 0 : index
    %326 = vector.load %arg35[%c12_232, %c0_233] : memref<16x32xf32, #tpu.memory_space<vmem>>, vector<2x32xf32>
    %327 = arith.mulf %318, %311 : vector<2x32xf32>
    %328 = arith.addf %326, %327 : vector<2x32xf32>
    %329 = math.tanh %328 : vector<2x32xf32>
    %cst_234 = arith.constant 1.000000e+00 : f32
    %330 = vector.broadcast %cst_234 : f32 to vector<2x32xf32>
    %331 = arith.subf %330, %325 : vector<2x32xf32>
    %332 = arith.mulf %331, %329 : vector<2x32xf32>
    %333 = arith.mulf %325, %295 : vector<2x32xf32>
    %334 = arith.addf %332, %333 : vector<2x32xf32>
    %c12_235 = arith.constant 12 : index
    %c0_236 = arith.constant 0 : index
    %335 = vector.load %arg36[%c12_235, %c0_236] : memref<16x32xf32, #tpu.memory_space<vmem>>, vector<2x32xf32>
    tpu.vector_store %arg36[%c12_235, %c0_236], %334 {strides = array<i32>} : memref<16x32xf32, #tpu.memory_space<vmem>>, vector<2x32xf32>,
    %c0_237 = arith.constant 0 : index
    %c0_238 = arith.constant 0 : index
    %336 = vector.load %arg22[%c0_237, %c0_238] : memref<32x32xf32, #tpu.memory_space<vmem>>, vector<32x32xf32>
    %cst_239 = arith.constant dense<0.000000e+00> : vector<2x32xf32>
    %337 = tpu.matmul %334, %336, %cst_239 {dimension_numbers = #tpu.dot_dimension_numbers<[1], [0], [0], [1], [0, 0, 1, 1], [], []>} : vector<2x32xf32>, vector<32x32xf32>, vector<2x32xf32> -> vector<2x32xf32>
    %c0_240 = arith.constant 0 : index
    %c0_241 = arith.constant 0 : index
    %338 = vector.load %arg25[%c0_240, %c0_241] : memref<1x32xf32, #tpu.memory_space<vmem>>, vector<1x32xf32>
    %339 = vector.broadcast %338 : vector<1x32xf32> to vector<2x32xf32>
    %340 = arith.addf %337, %339 : vector<2x32xf32>
    %c0_242 = arith.constant 0 : index
    %c0_243 = arith.constant 0 : index
    %341 = vector.load %arg23[%c0_242, %c0_243] : memref<32x32xf32, #tpu.memory_space<vmem>>, vector<32x32xf32>
    %cst_244 = arith.constant dense<0.000000e+00> : vector<2x32xf32>
    %342 = tpu.matmul %334, %341, %cst_244 {dimension_numbers = #tpu.dot_dimension_numbers<[1], [0], [0], [1], [0, 0, 1, 1], [], []>} : vector<2x32xf32>, vector<32x32xf32>, vector<2x32xf32> -> vector<2x32xf32>
    %c0_245 = arith.constant 0 : index
    %c0_246 = arith.constant 0 : index
    %343 = vector.load %arg26[%c0_245, %c0_246] : memref<1x32xf32, #tpu.memory_space<vmem>>, vector<1x32xf32>
    %344 = vector.broadcast %343 : vector<1x32xf32> to vector<2x32xf32>
    %345 = arith.addf %342, %344 : vector<2x32xf32>
    %c0_247 = arith.constant 0 : index
    %c0_248 = arith.constant 0 : index
    %346 = vector.load %arg24[%c0_247, %c0_248] : memref<32x32xf32, #tpu.memory_space<vmem>>, vector<32x32xf32>
    %cst_249 = arith.constant dense<0.000000e+00> : vector<2x32xf32>
    %347 = tpu.matmul %334, %346, %cst_249 {dimension_numbers = #tpu.dot_dimension_numbers<[1], [0], [0], [1], [0, 0, 1, 1], [], []>} : vector<2x32xf32>, vector<32x32xf32>, vector<2x32xf32> -> vector<2x32xf32>
    %c0_250 = arith.constant 0 : index
    %c0_251 = arith.constant 0 : index
    %348 = vector.load %arg27[%c0_250, %c0_251] : memref<1x32xf32, #tpu.memory_space<vmem>>, vector<1x32xf32>
    %349 = vector.broadcast %348 : vector<1x32xf32> to vector<2x32xf32>
    %350 = arith.addf %347, %349 : vector<2x32xf32>
    %c14 = arith.constant 14 : index
    %c0_252 = arith.constant 0 : index
    %351 = vector.load %arg33[%c14, %c0_252] : memref<16x32xf32, #tpu.memory_space<vmem>>, vector<2x32xf32>
    %352 = arith.addf %351, %340 : vector<2x32xf32>
    %353 = arith.negf %352 : vector<2x32xf32>
    %354 = math.exp %353 : vector<2x32xf32>
    %cst_253 = arith.constant 1.000000e+00 : f32
    %355 = vector.broadcast %cst_253 : f32 to vector<2x32xf32>
    %356 = arith.addf %355, %354 : vector<2x32xf32>
    %357 = arith.divf %355, %356 : vector<2x32xf32>
    %c14_254 = arith.constant 14 : index
    %c0_255 = arith.constant 0 : index
    %358 = vector.load %arg34[%c14_254, %c0_255] : memref<16x32xf32, #tpu.memory_space<vmem>>, vector<2x32xf32>
    %359 = arith.addf %358, %345 : vector<2x32xf32>
    %360 = arith.negf %359 : vector<2x32xf32>
    %361 = math.exp %360 : vector<2x32xf32>
    %cst_256 = arith.constant 1.000000e+00 : f32
    %362 = vector.broadcast %cst_256 : f32 to vector<2x32xf32>
    %363 = arith.addf %362, %361 : vector<2x32xf32>
    %364 = arith.divf %362, %363 : vector<2x32xf32>
    %c14_257 = arith.constant 14 : index
    %c0_258 = arith.constant 0 : index
    %365 = vector.load %arg35[%c14_257, %c0_258] : memref<16x32xf32, #tpu.memory_space<vmem>>, vector<2x32xf32>
    %366 = arith.mulf %357, %350 : vector<2x32xf32>
    %367 = arith.addf %365, %366 : vector<2x32xf32>
    %368 = math.tanh %367 : vector<2x32xf32>
    %cst_259 = arith.constant 1.000000e+00 : f32
    %369 = vector.broadcast %cst_259 : f32 to vector<2x32xf32>
    %370 = arith.subf %369, %364 : vector<2x32xf32>
    %371 = arith.mulf %370, %368 : vector<2x32xf32>
    %372 = arith.mulf %364, %334 : vector<2x32xf32>
    %373 = arith.addf %371, %372 : vector<2x32xf32>
    %c14_260 = arith.constant 14 : index
    %c0_261 = arith.constant 0 : index
    %374 = vector.load %arg36[%c14_260, %c0_261] : memref<16x32xf32, #tpu.memory_space<vmem>>, vector<2x32xf32>
    tpu.vector_store %arg36[%c14_260, %c0_261], %373 {strides = array<i32>} : memref<16x32xf32, #tpu.memory_space<vmem>>, vector<2x32xf32>,
    %c0_262 = arith.constant 0 : index
    %c0_263 = arith.constant 0 : index
    %375 = vector.load %arg36[%c0_262, %c0_263] : memref<16x32xf32, #tpu.memory_space<vmem>>, vector<16x32xf32>
    %c0_264 = arith.constant 0 : index
    %c0_265 = arith.constant 0 : index
    %376 = vector.load %arg28[%c0_264, %c0_265] : memref<32x64xf32, #tpu.memory_space<vmem>>, vector<32x64xf32>
    %cst_266 = arith.constant dense<0.000000e+00> : vector<16x64xf32>
    %377 = tpu.matmul %375, %376, %cst_266 {dimension_numbers = #tpu.dot_dimension_numbers<[1], [0], [0], [1], [0, 0, 1, 1], [], []>} : vector<16x32xf32>, vector<32x64xf32>, vector<16x64xf32> -> vector<16x64xf32>
    %c0_267 = arith.constant 0 : index
    %c0_268 = arith.constant 0 : index
    %378 = vector.load %arg29[%c0_267, %c0_268] : memref<1x64xf32, #tpu.memory_space<vmem>>, vector<1x64xf32>
    %379 = vector.broadcast %378 : vector<1x64xf32> to vector<16x64xf32>
    %380 = arith.addf %377, %379 : vector<16x64xf32>
    %c0_269 = arith.constant 0 : index
    %c0_270 = arith.constant 0 : index
    %381 = vector.load %arg30[%c0_269, %c0_270] : memref<64x128xf32, #tpu.memory_space<vmem>>, vector<64x128xf32>
    %cst_271 = arith.constant dense<0.000000e+00> : vector<16x128xf32>
    %382 = tpu.matmul %380, %381, %cst_271 {dimension_numbers = #tpu.dot_dimension_numbers<[1], [0], [0], [1], [0, 0, 1, 1], [], []>} : vector<16x64xf32>, vector<64x128xf32>, vector<16x128xf32> -> vector<16x128xf32>
    %c0_272 = arith.constant 0 : index
    %c0_273 = arith.constant 0 : index
    %383 = vector.load %arg31[%c0_272, %c0_273] : memref<1x128xf32, #tpu.memory_space<vmem>>, vector<1x128xf32>
    %384 = vector.broadcast %383 : vector<1x128xf32> to vector<16x128xf32>
    %385 = arith.addf %382, %384 : vector<16x128xf32>
    %c0_274 = arith.constant 0 : index
    %c0_275 = arith.constant 0 : index
    %386 = vector.load %arg32[%c0_274, %c0_275] : memref<16x128xf32, #tpu.memory_space<vmem>>, vector<16x128xf32>
    tpu.vector_store %arg32[%c0_274, %c0_275], %385 {strides = array<i32>} : memref<16x128xf32, #tpu.memory_space<vmem>>, vector<16x128xf32>,
    return
  }
  func.func @transform_0(%arg0: i32) -> (i32, i32) {
    %c0_i32 = arith.constant 0 : i32
    %c0_i32_0 = arith.constant 0 : i32
    %c0_i32_1 = arith.constant 0 : i32
    return %c0_i32, %c0_i32_0 : i32, i32
  }
  func.func @transform_1(%arg0: i32) -> (i32, i32) {
    %c0_i32 = arith.constant 0 : i32
    %c0_i32_0 = arith.constant 0 : i32
    %c0_i32_1 = arith.constant 0 : i32
    return %c0_i32, %c0_i32_0 : i32, i32
  }
  func.func @transform_2(%arg0: i32) -> (i32, i32) {
    %c0_i32 = arith.constant 0 : i32
    %c0_i32_0 = arith.constant 0 : i32
    %c0_i32_1 = arith.constant 0 : i32
    return %c0_i32, %c0_i32_0 : i32, i32
  }
  func.func @transform_3(%arg0: i32) -> (i32, i32) {
    %c0_i32 = arith.constant 0 : i32
    %c0_i32_0 = arith.constant 0 : i32
    %c0_i32_1 = arith.constant 0 : i32
    return %c0_i32, %c0_i32_0 : i32, i32
  }
  func.func @transform_4(%arg0: i32) -> (i32, i32) {
    %c0_i32 = arith.constant 0 : i32
    %c0_i32_0 = arith.constant 0 : i32
    %c0_i32_1 = arith.constant 0 : i32
    return %c0_i32, %c0_i32_0 : i32, i32
  }
  func.func @transform_5(%arg0: i32) -> (i32, i32) {
    %c0_i32 = arith.constant 0 : i32
    %c0_i32_0 = arith.constant 0 : i32
    %c0_i32_1 = arith.constant 0 : i32
    return %c0_i32, %c0_i32_0 : i32, i32
  }
  func.func @transform_6(%arg0: i32) -> (i32, i32) {
    %c0_i32 = arith.constant 0 : i32
    %c0_i32_0 = arith.constant 0 : i32
    %c0_i32_1 = arith.constant 0 : i32
    return %c0_i32, %c0_i32_0 : i32, i32
  }
  func.func @transform_7(%arg0: i32) -> (i32, i32) {
    %c0_i32 = arith.constant 0 : i32
    %c0_i32_0 = arith.constant 0 : i32
    %c0_i32_1 = arith.constant 0 : i32
    return %c0_i32, %c0_i32_0 : i32, i32
  }
  func.func @transform_8(%arg0: i32) -> (i32, i32) {
    %c0_i32 = arith.constant 0 : i32
    %c0_i32_0 = arith.constant 0 : i32
    %c0_i32_1 = arith.constant 0 : i32
    return %c0_i32, %c0_i32_0 : i32, i32
  }
  func.func @transform_9(%arg0: i32) -> (i32, i32) {
    %c0_i32 = arith.constant 0 : i32
    %c0_i32_0 = arith.constant 0 : i32
    %c0_i32_1 = arith.constant 0 : i32
    return %c0_i32, %c0_i32_0 : i32, i32
  }
  func.func @transform_10(%arg0: i32) -> (i32, i32) {
    %c0_i32 = arith.constant 0 : i32
    %c0_i32_0 = arith.constant 0 : i32
    %c0_i32_1 = arith.constant 0 : i32
    return %c0_i32, %c0_i32_0 : i32, i32
  }
  func.func @transform_11(%arg0: i32) -> (i32, i32) {
    %c0_i32 = arith.constant 0 : i32
    %c0_i32_0 = arith.constant 0 : i32
    %c0_i32_1 = arith.constant 0 : i32
    return %c0_i32, %c0_i32_0 : i32, i32
  }
  func.func @transform_12(%arg0: i32) -> (i32, i32) {
    %c0_i32 = arith.constant 0 : i32
    %c0_i32_0 = arith.constant 0 : i32
    %c0_i32_1 = arith.constant 0 : i32
    return %c0_i32, %c0_i32_0 : i32, i32
  }
  func.func @transform_13(%arg0: i32) -> (i32, i32) {
    %c0_i32 = arith.constant 0 : i32
    %c0_i32_0 = arith.constant 0 : i32
    %c0_i32_1 = arith.constant 0 : i32
    return %c0_i32, %c0_i32_0 : i32, i32
  }
  func.func @transform_14(%arg0: i32) -> (i32, i32) {
    %c0_i32 = arith.constant 0 : i32
    %c0_i32_0 = arith.constant 0 : i32
    %c0_i32_1 = arith.constant 0 : i32
    return %c0_i32, %c0_i32_0 : i32, i32
  }
  func.func @transform_15(%arg0: i32) -> (i32, i32) {
    %c0_i32 = arith.constant 0 : i32
    %c0_i32_0 = arith.constant 0 : i32
    %c0_i32_1 = arith.constant 0 : i32
    return %c0_i32, %c0_i32_0 : i32, i32
  }
  func.func @transform_16(%arg0: i32) -> (i32, i32) {
    %c0_i32 = arith.constant 0 : i32
    %c0_i32_0 = arith.constant 0 : i32
    %c0_i32_1 = arith.constant 0 : i32
    return %c0_i32, %c0_i32_0 : i32, i32
  }
  func.func @transform_17(%arg0: i32) -> (i32, i32) {
    %c0_i32 = arith.constant 0 : i32
    %c0_i32_0 = arith.constant 0 : i32
    %c0_i32_1 = arith.constant 0 : i32
    return %c0_i32, %c0_i32_0 : i32, i32
  }
  func.func @transform_18(%arg0: i32) -> (i32, i32) {
    %c0_i32 = arith.constant 0 : i32
    %c0_i32_0 = arith.constant 0 : i32
    %c0_i32_1 = arith.constant 0 : i32
    return %c0_i32, %c0_i32_0 : i32, i32
  }
  func.func @transform_19(%arg0: i32) -> (i32, i32) {
    %c0_i32 = arith.constant 0 : i32
    %c0_i32_0 = arith.constant 0 : i32
    %c0_i32_1 = arith.constant 0 : i32
    return %c0_i32, %c0_i32_0 : i32, i32
  }
  func.func @transform_20(%arg0: i32) -> (i32, i32) {
    %c0_i32 = arith.constant 0 : i32
    %c0_i32_0 = arith.constant 0 : i32
    %c0_i32_1 = arith.constant 0 : i32
    return %c0_i32, %c0_i32_0 : i32, i32
  }
  func.func @transform_21(%arg0: i32) -> (i32, i32) {
    %c0_i32 = arith.constant 0 : i32
    %c0_i32_0 = arith.constant 0 : i32
    %c0_i32_1 = arith.constant 0 : i32
    return %c0_i32, %c0_i32_0 : i32, i32
  }
  func.func @transform_22(%arg0: i32) -> (i32, i32) {
    %c0_i32 = arith.constant 0 : i32
    %c0_i32_0 = arith.constant 0 : i32
    %c0_i32_1 = arith.constant 0 : i32
    return %c0_i32, %c0_i32_0 : i32, i32
  }
  func.func @transform_23(%arg0: i32) -> (i32, i32) {
    %c0_i32 = arith.constant 0 : i32
    %c0_i32_0 = arith.constant 0 : i32
    %c0_i32_1 = arith.constant 0 : i32
    return %c0_i32, %c0_i32_0 : i32, i32
  }
  func.func @transform_24(%arg0: i32) -> (i32, i32) {
    %c0_i32 = arith.constant 0 : i32
    %c0_i32_0 = arith.constant 0 : i32
    %c0_i32_1 = arith.constant 0 : i32
    return %c0_i32, %c0_i32_0 : i32, i32
  }
  func.func @transform_25(%arg0: i32) -> (i32, i32) {
    %c0_i32 = arith.constant 0 : i32
    %c0_i32_0 = arith.constant 0 : i32
    %c0_i32_1 = arith.constant 0 : i32
    return %c0_i32, %c0_i32_0 : i32, i32
  }
  func.func @transform_26(%arg0: i32) -> (i32, i32) {
    %c0_i32 = arith.constant 0 : i32
    %c0_i32_0 = arith.constant 0 : i32
    %c0_i32_1 = arith.constant 0 : i32
    return %c0_i32, %c0_i32_0 : i32, i32
  }
  func.func @transform_27(%arg0: i32) -> (i32, i32) {
    %c0_i32 = arith.constant 0 : i32
    %c0_i32_0 = arith.constant 0 : i32
    %c0_i32_1 = arith.constant 0 : i32
    return %c0_i32, %c0_i32_0 : i32, i32
  }
  func.func @transform_28(%arg0: i32) -> (i32, i32) {
    %c0_i32 = arith.constant 0 : i32
    %c0_i32_0 = arith.constant 0 : i32
    %c0_i32_1 = arith.constant 0 : i32
    return %c0_i32, %c0_i32_0 : i32, i32
  }
  func.func @transform_29(%arg0: i32) -> (i32, i32) {
    %c0_i32 = arith.constant 0 : i32
    %c0_i32_0 = arith.constant 0 : i32
    %c0_i32_1 = arith.constant 0 : i32
    return %c0_i32, %c0_i32_0 : i32, i32
  }
  func.func @transform_30(%arg0: i32) -> (i32, i32) {
    %c0_i32 = arith.constant 0 : i32
    %c0_i32_0 = arith.constant 0 : i32
    %c0_i32_1 = arith.constant 0 : i32
    return %c0_i32, %c0_i32_0 : i32, i32
  }
  func.func @transform_31(%arg0: i32) -> (i32, i32) {
    %c0_i32 = arith.constant 0 : i32
    %c0_i32_0 = arith.constant 0 : i32
    %c0_i32_1 = arith.constant 0 : i32
    return %c0_i32, %c0_i32_0 : i32, i32
  }
}

</mosaic_0001>

<bundles_post_ra>
// kernel: encoder_forward.1
= control target key start
LH: loop header
LB: loop body
LE: loop exit
PB: predicated region body
PF: predicated region fallthrough
CT: control target
= control target key end

     0   :  { %s4446_s3 = smov 3   ;;  %s4447_s10 = smov 7   ;;  %v4448_v0 = vmov 0   ;;  %vm147_vm0 = vcmask 1043456   ;;  %vm140_vm1 = vcmask 31744   ;;  %vm278_vm2 = vcmask 1041408   ;;  %s4890_s0 = inlined_call_operand.smem [shape: u32[32], index: -1, kind: input, shape index: {}] }
   0x1   :  { %s3474_s6 = sld [smem:[%s4890_s0 + %s4446_s3]]   ;;  %4365 = vset.pattern.permute.xlu0 %v4448_v0  ;;  %s4449_s14 = smov 2   ;;  %vm4451_vm3 = vmmov 1   ;;  %vm271_vm5 = vcmask 80896   ;;  %vm361_vm6 = vcmask 64512   ;;  %vm526_vm7 = vcmask 130048  }
   0x2   :  { %s1_s9 = sld [smem:[%s4890_s0]]   ;;  %s4450_s18 = smov 1   ;;  %vm4132_vm4 = vmpackc.low %vm278_vm2, %vm4451_vm3  ;;  %v4466_v45 = vmov 0.0|0.0   ;;  %vm4468_vm8 = vmmov 0   ;;  %v4469_v58 = vmov 0.0   ;;  %vm619_vm9 = vcmask 261120  }
   0x3   :  { %s3478_s13 = sld [smem:[%s4890_s0 + %s4447_s10]]   ;;  %s4452_s22 = smov 12   ;;  %vm1376_vm10 = vcmask 254976   ;;  %vm3384_vm11 = vcmask 523264  }
   0x4   :  { %s3473_s17 = sld [smem:[%s4890_s0 + %s4449_s14]]   ;;  %s4453_s26 = smov 13  }
   0x5   :  { %s3472_s21 = sld [smem:[%s4890_s0 + %s4450_s18]]   ;;  %s4454_s30 = smov 9  }
   0x6   :  { %s3483_s25 = sld [smem:[%s4890_s0 + %s4452_s22]]   ;;  %s4455_s4 = smov 10  }
   0x7   :  { %v132_v1 = vld [vmem:[%s3474_s6] sm:$0xf]  ;;  %s3484_s29 = sld [smem:[%s4890_s0 + %s4453_s26]]   ;;  %s4456_s8 = smov 5  }
   0x8   :  { %v130_v2 = vld [vmem:[%s1_s9] sm:$0xff]  ;;  %v131_v3 = vld [vmem:[%s1_s9 + $0x8] sm:$0xff]  ;;  %3774 = vmatprep.subr.msk.mxu0 %vm147_vm0, %v132_v1  ;;  %s3480_s3 = sld [smem:[%s4890_s0 + %s4454_s30]]   ;;  %s4457_s12 = smov 6  }
   0x9   :  { %3776 = vmatprep.mubr.msk.f32.mxu0 %vm140_vm1, %v130_v2  ;;  %v262_v4 = vld [vmem:[%s3478_s13] sm:$0xff]  ;;  %v263_v5 = vld [vmem:[%s3478_s13 + $0x8] sm:$0x3]  ;;  %3775 = vmatpush3.msk.msra.mxu0 %vm147_vm0, %v132_v1  ;;  %s3481_s7 = sld [smem:[%s4890_s0 + %s4455_s4]]   ;;  %s4458_s16 = smov 15  }
   0xa   :  { %v4131_v6 = vpack.c.bf16 %v263_v5, %v262_v4  ;;  %v260_v7 = vld [vmem:[%s3473_s17] sm:$0xff]  ;;  %3777 = vmatmul.mubr.msk.f32.vlgmr.msra.gmra.mrb[0].mxu0 %vm140_vm1, %v131_v3  ;;  %v261_v9 = vld [vmem:[%s3473_s17 + $0x8] sm:$0xff]  ;;  %s3476_s11 = sld [smem:[%s4890_s0 + %s4456_s8]]   ;;  %s4459_s20 = smov 16  }
   0xb   :  { %v228_v8 = vld [vmem:[%s3472_s21] sm:$0xff]  ;;  %3783 = vmatprep.mubr.msk.f32.mxu0 %vm271_vm5, %v260_v7  ;;  %v229_v10 = vld [vmem:[%s3472_s21 + $0x8] sm:$0xff]  ;;  %s3477_s15 = sld [smem:[%s4890_s0 + %s4457_s12]]   ;;  %s4460_s24 = smov 4  }
   0xc   :  { %4133 = vmatprep.subr.msk.bf16.mxu0 %vm4132_vm4, %v4131_v6  ;;  %233 = vperm.xlu0 %4365, %v228_v8   ;;  %v360_v11 = vld [vmem:[%s3483_s25] sm:$0xff]  ;;  %s3486_s19 = sld [smem:[%s4890_s0 + %s4458_s16]]   ;;  %s4461_s28 = smov 8  }
   0xd   :  { %4136 = vmatpush3.bf16.msk.msra.mxu0 %vm4132_vm4, %v4131_v6  ;;  %v623_v12 = vld [vmem:[%s3484_s29] sm:$0xff]  ;;  %s3487_s23 = sld [smem:[%s4890_s0 + %s4459_s20]]   ;;  %s4462_s2 = smov 14  }
   0xe   :  { %3786 = vmatprep.subr.mxu0 %v360_v11  ;;  %3803 = vmatprep.subr.mxu1 %v623_v12  ;;  %v359_v13 = vld [vmem:[%s3480_s3] sm:$0xff]  ;;  %s3475_s27 = sld [smem:[%s4890_s0 + %s4460_s24]]   ;;  %s4463_s6 = smov 21  }
   0xf   :  { %3804 = vmatpush3.msra.mxu1 %v623_v12  ;;  %v622_v14 = vld [vmem:[%s3481_s7] sm:$0xff]  ;;  %s3479_s1 = sld [smem:[%s4890_s0 + %s4461_s28]]   ;;  %s4464_s10 = smov 11  }
  0x10   :  { %3784 = vmatmul.mubr.msk.f32.vlgmr.msra.gmra.mrb[2].mxu0 %vm271_vm5, %v261_v9  ;;  %238 = vperm.xlu0 %4365, %v229_v10   ;;  %v3507_v15 = vld [vmem:[%s3476_s11] ss:$0 sm:$0xff]  ;;  %s3485_s5 = sld [smem:[%s4890_s0 + %s4462_s2]]   ;;  %s4465_s14 = smov 17  }
  0x11   :  { %3787 = vmatpush3.msra.mxu0 %v360_v11  ;;  %3808 = vmatprep.subr.mxu1 %v622_v14  ;;  %v3508_v16 = vld [vmem:[%s3477_s15] ss:$0 sm:$0xff]  ;;  %s4550_s9 = sld [smem:[%s4890_s0 + %s4463_s6]]   ;;  %s4467_s18 = smov 22  }
  0x12   :  { %3791 = vmatprep.subr.mxu0 %v359_v13  ;;  %v524_v23 = vld [vmem:[%s3486_s19] sm:$0xff]  ;;  %v525_v24 = vld [vmem:[%s3486_s19 + $0x8] sm:$0xff]  ;;  %s3482_s13 = sld [smem:[%s4890_s0 + %s4464_s10]]   ;;  %s4470_s22 = smov 23  }
  0x13   :  { %v774_v25 = vld [vmem:[%s3487_s23] sm:$0xff]  ;;  %v775_v26 = vld [vmem:[%s3487_s23 + $0x8] sm:$0xff]  ;;  %v4137_v29 = vpack.c.bf16 %v525_v24, %v524_v23  ;;  %s3488_s17 = sld [smem:[%s4890_s0 + %s4465_s14]]   ;;  %s4471_s26 = smov 18  }
  0x14   :  { %v4141_v30 = vpack.c.bf16 %v775_v26, %v774_v25  ;;  %v3503_v31 = vld [vmem:[%s3475_s27] ss:$0 sm:$0xff]  ;;  %s4572_s21 = sld [smem:[%s4890_s0 + %s4467_s18]]   ;;  %s4472_s30 = smov 19  }
  0x15   :  { %v3509_v37 = vld [vmem:[%s3479_s1] ss:$0 sm:$0xff]  ;;  %s4604_s25 = sld [smem:[%s4890_s0 + %s4470_s22]]   ;;  %s4473_s4 = smov 24  }
  0x16   :  { %v865_v41 = vld [vmem:[%s3485_s5] sm:$0xff]  ;;  %s3489_s29 = sld [smem:[%s4890_s0 + %s4471_s26]]   ;;  %s4474_s8 = smov 25  }
  0x17   :  { %v1106_v46 = vld [vmem:[%s4550_s9] sm:$0xff]  ;;  %v1107_v47 = vld [vmem:[%s4550_s9 + $0x8] sm:$0xff]  ;;  %v1108_v50 = vld [vmem:[%s4550_s9 + $0x10] sm:$0xff]  ;;  %s3490_s3 = sld [smem:[%s4890_s0 + %s4472_s30]]   ;;  %s4478_s24 = smov 29  }
  0x18   :  { %v4576_v48 = vpack.c.bf16 %v1107_v47, %v1106_v46  ;;  %v1109_v51 = vld [vmem:[%s4550_s9 + $0x18] sm:$0xff]  ;;  %v864_v52 = vld [vmem:[%s3482_s13] sm:$0xff]  ;;  %s3495_s7 = sld [smem:[%s4890_s0 + %s4473_s4]]   ;;  %s4475_s13 = smov 20  }
  0x19   :  { %v1016_v53 = vld [vmem:[%s3488_s17] sm:$0xff]  ;;  %v1017_v54 = vld [vmem:[%s3488_s17 + $0x8] sm:$0xff]  ;;  %v4585_v55 = vpack.c.bf16 %v1109_v51, %v1108_v50  ;;  %s3496_s12 = sld [smem:[%s4890_s0 + %s4474_s8]]   ;;  %s4476_s17 = smov 26  }
  0x1a   :  { %v1190_v56 = vld [vmem:[%s4572_s21] sm:$0xff]  ;;  %v1191_v57 = vld [vmem:[%s4572_s21 + $0x8] sm:$0xff]  ;;  %v4145_v59 = vpack.c.bf16 %v1017_v54, %v1016_v53  ;;  %v1192_v61 = vld [vmem:[%s4572_s21 + $0x10] sm:$0xff]  ;;  %s3491_s16 = sld [smem:[%s4890_s0 + %s4475_s13]]   ;;  %s4479_s28 = smov 28  }
  0x1b   :  { %v4596_v60 = vpack.c.bf16 %v1191_v57, %v1190_v56  ;;  %v1193_v62 = vld [vmem:[%s4572_s21 + $0x18] sm:$0xff]  ;;  %v1271_v0 = vld [vmem:[%s4604_s25] sm:$0xff]  ;;  %v1272_v1 = vld [vmem:[%s4604_s25 + $0x8] sm:$0xff]  ;;  %s3497_s20 = sld [smem:[%s4890_s0 + %s4476_s17]]   ;;  %s4480_s2 = smov 30  }
  0x1c   :  { %v4608_v63 = vpack.c.bf16 %v1193_v62, %v1192_v61  ;;  %v4622_v2 = vpack.c.bf16 %v1272_v1, %v1271_v0  ;;  %v1273_v3 = vld [vmem:[%s4604_s25 + $0x10] sm:$0xff]  ;;  %v1274_v4 = vld [vmem:[%s4604_s25 + $0x18] sm:$0xff]  ;;  %v3519_v6 = vld [vmem:[%s3489_s29] ss:$0 sm:$0xff]  ;;  %s4865_s27 = sld [smem:[%s4890_s0 + %s4478_s24]]   ;;  %s4481_s6 = smov 31  }
  0x1d   :  { %v4632_v5 = vpack.c.bf16 %v1274_v4, %v1273_v3  ;;  %v3526_v7 = vld [vmem:[%s3490_s3] ss:$0 sm:$0xff]  ;;  %s3499_s1 = sld [smem:[%s4890_s0 + %s4479_s28]]  }
  0x1e   :  { %s3501_s5 = sld [smem:[%s4890_s0 + %s4480_s2]]  }
  0x1f   :  { %v4670_v23 = vld [vmem:[%s3496_s12] ss:$0 sm:$0xff]  ;;  %s3502_s10 = sld [smem:[%s4890_s0 + %s4481_s6]]  }
  0x8b   :  { %v234_v17 = vpop.permute.xlu0 %233 }
  0x8c   :  { %v247_v18 = vmul.f32 %v3507_v15, %v234_v17 }
  0x8e   :  { %v256_v19 = vadd.f32 %v3508_v16, %v247_v18 }
  0x8f   :  { %v239_v20 = vpop.permute.xlu0 %238 }
  0x90   :  { %v4526_v21 = vmax.f32 %v256_v19, 0.0  ;;  %v248_v22 = vmul.f32 %v3507_v15, %v239_v20 }
  0x92   :  { %v257_v27 = vadd.f32 %v3508_v16, %v248_v22  ;;  %3788 = vmatprep.mubr.msk.f32.mxu0 %vm361_vm6, %v4526_v21  ;;  %3805 = vmatprep.mubr.msk.f32.mxu1 %vm361_vm6, %v4526_v21  ;;  %v4661_v16 = vld [vmem:[%s3495_s7] ss:$0 sm:$0xff] }
  0x94   :  { %v4532_v28 = vmax.f32 %v257_v27, 0.0 }
  0x96   :  { %3789 = vmatmul.mubr.msk.f32.vlgmr.msra.gmra.mrb[4].mxu0 %vm361_vm6, %v4532_v28  ;;  %3806 = vmatmul.mubr.msk.f32.vlgmr.msra.gmra.mrb[0].mxu1 %vm361_vm6, %v4532_v28 }
  0x97   :  { %3792 = vmatpush3.msra.mxu0 %v359_v13  ;;  %3809 = vmatpush3.msra.mxu1 %v622_v14 }
  0x98   :  { %4138 = vmatprep.subr.bf16.mxu0 %v4137_v29  ;;  %4142 = vmatprep.subr.bf16.mxu1 %v4141_v30 }
  0xdd   :  { %v3778_v32 = vpop.f32.mrb[0].mxu0 }
  0xde   :  { %v223_v33 = vadd.f32 %v3778_v32, %v3503_v31  ;;  %v217_v34 = vpop.f32.mrb[1].mxu0 }
  0xdf   :  { %v218_v35 = vadd.f32 %v3503_v31, %v217_v34 }
  0xe0   :  { %v4552_v38 = vmax.f32 %v223_v33, 0.0 }
  0xe1   :  { %v226_v36 = vmax.f32 %v218_v35, 0.0 }
  0xe3   :  { %v3785_v39 = vpop.f32.mrb[2].mxu0  ;;  %3793 = vmatprep.mubr.msk.f32.mxu0 %vm361_vm6, %v226_v36  ;;  %3810 = vmatprep.mubr.msk.f32.mxu1 %vm361_vm6, %v226_v36 }
  0xe4   :  { %v348_v40 = vpop.f32.mrb[3].mxu0  ;;  %3794 = vmatmul.mubr.msk.f32.vlgmr.msra.gmra.mrb[4].mxu0 %vm361_vm6, %v4552_v38  ;;  %3811 = vmatmul.mubr.msk.f32.vlgmr.msra.gmra.mrb[0].mxu1 %vm361_vm6, %v4552_v38  ;;  %v354_v43 = vadd.f32 %v3785_v39, %v3509_v37 }
  0xe5   :  { %v349_v42 = vadd.f32 %v3509_v37, %v348_v40  ;;  %4140 = vmatpush3.bf16.msra.mxu0 %v4137_v29  ;;  %4144 = vmatpush3.bf16.msra.mxu1 %v4141_v30  ;;  %v4678_v40 = vld [vmem:[%s3497_s20] ss:$0 sm:$0xff] }
  0xe6   :  { %4149 = vmatprep.subr.bf16.mxu1 %v4466_v45  ;;  %3820 = vmatprep.subr.mxu0 %v865_v41  ;;  %v358_v49 = vmax.f32 %v354_v43, 0.0 }
  0xe7   :  { %v357_v44 = vmax.f32 %v349_v42, 0.0 }
  0xe9   :  { %3800 = vmatprep.mubr.msk.f32.mxu0 %vm526_vm7, %v357_v44  ;;  %3817 = vmatprep.mubr.msk.f32.mxu1 %vm526_vm7, %v357_v44 }
  0xec   :  { %3801 = vmatmul.mubr.msk.f32.vlgmr.msra.gmra.mrb[4].mxu0 %vm526_vm7, %v358_v49  ;;  %3818 = vmatmul.mubr.msk.f32.vlgmr.msra.gmra.mrb[0].mxu1 %vm526_vm7, %v358_v49 }
  0xed   :  { %4151 = vmatpush3.bf16.msra.mxu1 %v4576_v48  ;;  %3822 = vmatprep.mubr.msk.f32.mxu0 %vm361_vm6, %v4526_v21 }
  0xee   :  { %3821 = vmatpush3.msra.mxu0 %v865_v41  ;;  %4152 = vmatprep.subr.bf16.mxu1 %v4466_v45 }
  0xef   :  { %3845 = vmatprep.mubr.msk.f32.mxu1 %vm4468_vm8, %v4469_v58  ;;  %3825 = vmatprep.subr.mxu0 %v864_v52 }
  0xf0   :  { %3823 = vmatmul.mubr.msk.f32.vlgmr.msra.gmra.mrb[6].mxu0 %vm361_vm6, %v4532_v28  ;;  %v3533_v28 = vld [vmem:[%s3491_s16] ss:$0 sm:$0xff] }
  0xf1   :  { %4154 = vmatpush3.bf16.msra.mxu1 %v4585_v55  ;;  %3827 = vmatprep.mubr.msk.f32.mxu0 %vm361_vm6, %v226_v36 }
  0xf2   :  { %4155 = vmatprep.subr.bf16.mxu1 %v4466_v45  ;;  %3826 = vmatpush3.msra.mxu0 %v864_v52 }
  0xf3   :  { %4146 = vmatprep.subr.bf16.mxu0 %v4145_v59 }
  0xf4   :  { %3846 = vmatmul.mubr.f32.vlgmr.msra.gmra.mrb[2].mxu1 %v4469_v58 }
  0xf5   :  { %4157 = vmatpush3.bf16.msra.mxu1 %v4596_v60  ;;  %3856 = vmatprep.mubr.msk.f32.mxu1 %vm4468_vm8, %v4469_v58 }
  0xf6   :  { %4158 = vmatprep.subr.bf16.mxu1 %v4466_v45 }
  0xf8   :  { %3828 = vmatmul.mubr.msk.f32.vlgmr.msra.gmra.mrb[6].mxu0 %vm361_vm6, %v4552_v38 }
  0xf9   :  { %4160 = vmatpush3.bf16.msra.mxu1 %v4608_v63  ;;  %3834 = vmatprep.mubr.msk.f32.mxu0 %vm526_vm7, %v357_v44 }
  0xfa   :  { %4148 = vmatpush3.bf16.msra.mxu0 %v4145_v59  ;;  %4167 = vmatprep.subr.bf16.mxu1 %v4466_v45 }
  0xfb   :  { %4161 = vmatprep.subr.bf16.mxu0 %v4466_v45 }
  0xfc   :  { %3857 = vmatmul.mubr.f32.vlgmr.msra.gmra.mrb[4].mxu1 %v4469_v58 }
  0xfd   :  { %4169 = vmatpush3.bf16.msra.mxu1 %v4576_v48  ;;  %3878 = vmatprep.mubr.msk.f32.mxu1 %vm4468_vm8, %v4469_v58 }
  0xfe   :  { %4170 = vmatprep.subr.bf16.mxu1 %v4466_v45 }
 0x100   :  { %3835 = vmatmul.mubr.msk.f32.vlgmr.msra.gmra.mrb[6].mxu0 %vm526_vm7, %v358_v49 }
 0x101   :  { %4163 = vmatpush3.bf16.msra.mxu0 %v4622_v2  ;;  %3867 = vmatprep.mubr.msk.f32.mxu0 %vm4468_vm8, %v4469_v58 }
 0x102   :  { %4164 = vmatprep.subr.bf16.mxu0 %v4466_v45  ;;  %4172 = vmatpush3.bf16.msra.mxu1 %v4585_v55 }
 0x103   :  { %4179 = vmatprep.subr.bf16.mxu1 %v4466_v45 }
 0x105   :  { %4166 = vmatpush3.bf16.msra.mxu0 %v4632_v5 }
 0x106   :  { %4173 = vmatprep.subr.bf16.mxu0 %v4466_v45 }
 0x108   :  { %3868 = vmatmul.mubr.f32.vlgmr.msra.gmra.mrb[8].mxu0 %v4469_v58 }
 0x109   :  { %4175 = vmatpush3.bf16.msra.mxu0 %v4596_v60  ;;  %3889 = vmatprep.mubr.msk.f32.mxu0 %vm4468_vm8, %v4469_v58 }
 0x10a   :  { %4176 = vmatprep.subr.bf16.mxu0 %v4466_v45 }
 0x10d   :  { %4178 = vmatpush3.bf16.msra.mxu0 %v4608_v63 }
 0x10e   :  { %4185 = vmatprep.subr.bf16.mxu0 %v4466_v45 }
 0x1bf   :  { %v3802_v8 = vpop.f32.mrb[4].mxu0  ;;  %v3819_v9 = vpop.f32.mrb[0].mxu1 }
 0x1c0   :  { %v618_v10 = vadd.f32 %v3802_v8, %v3519_v6  ;;  %v861_v11 = vadd.f32 %v3819_v9, %v3526_v7  ;;  %v599_v12 = vpop.f32.mrb[5].mxu0  ;;  %v842_v13 = vpop.f32.mrb[1].mxu1 }
 0x1c1   :  { %v617_v14 = vadd.f32 %v3519_v6, %v599_v12  ;;  %v860_v15 = vadd.f32 %v3526_v7, %v842_v13 }
 0x1c2   :  { %621 = vst.msk [vmem:[#allocation2 + $0x8] sm:$0xff] %vm619_vm9, %v618_v10  ;;  %863 = vst.msk [vmem:[#allocation3 + $0x8] sm:$0xff] %vm619_vm9, %v861_v11 }
 0x1c3   :  { %620 = vst.msk [vmem:[#allocation2] sm:$0xff] %vm619_vm9, %v617_v14  ;;  %862 = vst.msk [vmem:[#allocation3] sm:$0xff] %vm619_vm9, %v860_v15 }
 0x1c7   :  { %v1186_v17 = vpop.f32.mrb[2].mxu1 }
 0x1c8   :  { %v1187_v18 = vadd.f32 %v4661_v16, %v1186_v17  ;;  %v3847_v19 = vpop.f32.mrb[3].mxu1 }
 0x1ca   :  { %v1352_v20 = vld [vmem:[#allocation2] sm:$0x3]  ;;  %v1360_v27 = vld [vmem:[#allocation3] sm:$0x3]  ;;  %v1624_v0 = vld [vmem:[#allocation2 + $0x2] sm:$0x3] }
 0x1cb   :  { %v1353_v21 = vadd.f32 %v1352_v20, %v1187_v18  ;;  %v1632_v6 = vld [vmem:[#allocation3 + $0x2] sm:$0x3] }
 0x1cd   :  { %v3537_v22 = vmul.f32 -1.442695, %v1353_v21 }
 0x1cf   :  { %4366 = vpow2.f32 %v3537_v22  ;;  %v1267_v24 = vpop.f32.mrb[4].mxu1 }
 0x1d0   :  { %v1268_v25 = vadd.f32 %v4670_v23, %v1267_v24  ;;  %v3858_v26 = vpop.f32.mrb[5].mxu1 }
 0x1d2   :  { %v1361_v29 = vadd.f32 %v1360_v27, %v1268_v25 }
 0x1d3   :  { %v3836_v30 = vpop.f32.mrb[6].mxu0 }
 0x1d4   :  { %v3538_v31 = vmul.f32 -1.442695, %v1361_v29  ;;  %v1103_v32 = vadd.f32 %v3836_v30, %v3533_v28  ;;  %v1084_v33 = vpop.f32.mrb[7].mxu0 }
 0x1d5   :  { %v1102_v34 = vadd.f32 %v3533_v28, %v1084_v33  ;;  %v1895_v33 = vld [vmem:[#allocation2 + $0x4] sm:$0x3] }
 0x1d6   :  { %4368 = vpow2.f32 %v3538_v31  ;;  %1105 = vst.msk [vmem:[#allocation4 + $0x8] sm:$0xff] %vm619_vm9, %v1103_v32 }
 0x1d7   :  { %1104 = vst.msk [vmem:[#allocation4] sm:$0xff] %vm619_vm9, %v1102_v34 }
 0x1d9   :  { %v4367_v35 = vpop.eup %4366 }
 0x1da   :  { %v1357_v36 = vadd.f32 1.0, %v4367_v35 }
 0x1db   :  { %v1348_v37 = vpop.f32.mrb[8].mxu0 }
 0x1dc   :  { %4370 = vrcp.f32 %v1357_v36  ;;  %v3869_v38 = vpop.f32.mrb[9].mxu0  ;;  %v1349_v42 = vadd.f32 %v4678_v40, %v1348_v37  ;;  %v1903_v37 = vld [vmem:[#allocation3 + $0x4] sm:$0x3] }
 0x1de   :  { %v1368_v46 = vld [vmem:[#allocation4] sm:$0x3]  ;;  %v1640_v19 = vld [vmem:[#allocation4 + $0x2] sm:$0x3] }
 0x1e0   :  { %v4369_v39 = vpop.eup %4368 }
 0x1e1   :  { %v1365_v41 = vadd.f32 1.0, %v4369_v39 }
 0x1e3   :  { %4372 = vrcp.f32 %v1365_v41 }
 0x1e6   :  { %v4371_v43 = vpop.eup %4370 }
 0x1e7   :  { %v1369_v44 = vmul.f32 %v4371_v43, %v1349_v42 }
 0x1e9   :  { %v1370_v47 = vadd.f32 %v1369_v44, %v1368_v46 }
 0x1eb   :  { %4374 = vtanh.f32 %v1370_v47 }
 0x1ed   :  { %v4373_v49 = vpop.eup %4372 }
 0x1ee   :  { %v1372_v50 = vsub.f32 1.0, %v4373_v49  ;;  %v1374_v53 = vmul.f32 0.0, %v4373_v49 }
 0x1f5   :  { %v4375_v51 = vpop.eup %4374 }
 0x1f6   :  { %v1373_v52 = vmul.f32 %v4375_v51, %v1372_v50 }
 0x1f8   :  { %v1375_v54 = vadd.f32 %v1374_v53, %v1373_v52  ;;  %v1911_v52 = vld [vmem:[#allocation4 + $0x4] sm:$0x3] }
 0x1fa   :  { %1377 = vst.msk [vmem:[#allocation5] sm:$0x3] %vm1376_vm10, %v1375_v54  ;;  %3879 = vmatmul.mubr.msk.f32.vlgmr.msra.gmra.mrb[6].mxu1 %vm619_vm9, %v1375_v54  ;;  %3890 = vmatmul.mubr.msk.f32.vlgmr.msra.gmra.mrb[10].mxu0 %vm619_vm9, %v1375_v54 }
 0x1fb   :  { %4181 = vmatpush3.bf16.msra.mxu1 %v4622_v2  ;;  %3900 = vmatprep.mubr.msk.f32.mxu1 %vm4468_vm8, %v4469_v58 }
 0x1fc   :  { %4182 = vmatprep.subr.bf16.mxu1 %v4466_v45  ;;  %4187 = vmatpush3.bf16.msra.mxu0 %v4576_v48 }
 0x1fd   :  { %4188 = vmatprep.subr.bf16.mxu0 %v4466_v45  ;;  %3911 = vmatprep.mubr.msk.f32.mxu0 %vm4468_vm8, %v4469_v58 }
 0x1ff   :  { %4184 = vmatpush3.bf16.msra.mxu1 %v4632_v5 }
 0x200   :  { %4191 = vmatprep.subr.bf16.mxu1 %v4466_v45  ;;  %4190 = vmatpush3.bf16.msra.mxu0 %v4585_v55 }
 0x201   :  { %4197 = vmatprep.subr.bf16.mxu0 %v4466_v45 }
 0x202   :  { %3901 = vmatmul.mubr.msk.f32.vlgmr.msra.gmra.mrb[8].mxu1 %vm619_vm9, %v1375_v54 }
 0x203   :  { %4193 = vmatpush3.bf16.msra.mxu1 %v4596_v60  ;;  %3922 = vmatprep.mubr.msk.f32.mxu1 %vm4468_vm8, %v4469_v58 }
 0x204   :  { %4194 = vmatprep.subr.bf16.mxu1 %v4466_v45 }
 0x207   :  { %4196 = vmatpush3.bf16.msra.mxu1 %v4608_v63 }
 0x208   :  { %4203 = vmatprep.subr.bf16.mxu1 %v4466_v45 }
 0x2cd   :  { %v1458_v56 = vpop.f32.mrb[6].mxu1  ;;  %v1539_v57 = vpop.f32.mrb[10].mxu0 }
 0x2ce   :  { %v1459_v59 = vadd.f32 %v4661_v16, %v1458_v56  ;;  %v3880_v61 = vpop.f32.mrb[7].mxu1  ;;  %v3891_v62 = vpop.f32.mrb[11].mxu0  ;;  %v1540_v1 = vadd.f32 %v4670_v23, %v1539_v57 }
 0x2d0   :  { %v1625_v3 = vadd.f32 %v1624_v0, %v1459_v59  ;;  %v1633_v7 = vadd.f32 %v1632_v6, %v1540_v1 }
 0x2d2   :  { %v3545_v4 = vmul.f32 -1.442695, %v1625_v3  ;;  %v3546_v10 = vmul.f32 -1.442695, %v1633_v7  ;;  %v2166_v7 = vld [vmem:[#allocation2 + $0x6] sm:$0x3] }
 0x2d4   :  { %4376 = vpow2.f32 %v3545_v4 }
 0x2d5   :  { %v1620_v8 = vpop.f32.mrb[8].mxu1  ;;  %4378 = vpow2.f32 %v3546_v10 }
 0x2d6   :  { %v3902_v9 = vpop.f32.mrb[9].mxu1  ;;  %v1621_v15 = vadd.f32 %v4678_v40, %v1620_v8 }
 0x2de   :  { %v4377_v11 = vpop.eup %4376 }
 0x2df   :  { %v1629_v12 = vadd.f32 1.0, %v4377_v11  ;;  %v4379_v13 = vpop.eup %4378  ;;  %v2174_v11 = vld [vmem:[#allocation3 + $0x6] sm:$0x3] }
 0x2e0   :  { %v1637_v14 = vadd.f32 1.0, %v4379_v13 }
 0x2e1   :  { %4380 = vrcp.f32 %v1629_v12 }
 0x2e2   :  { %4382 = vrcp.f32 %v1637_v14 }
 0x2eb   :  { %v4381_v17 = vpop.eup %4380 }
 0x2ec   :  { %v1641_v18 = vmul.f32 %v4381_v17, %v1621_v15  ;;  %v4383_v21 = vpop.eup %4382 }
 0x2ed   :  { %v1644_v22 = vsub.f32 1.0, %v4383_v21  ;;  %v1646_v26 = vmul.f32 %v4383_v21, %v1375_v54 }
 0x2ee   :  { %v1642_v20 = vadd.f32 %v1641_v18, %v1640_v19 }
 0x2f0   :  { %4384 = vtanh.f32 %v1642_v20 }
 0x2fa   :  { %v4385_v24 = vpop.eup %4384 }
 0x2fb   :  { %v1645_v25 = vmul.f32 %v4385_v24, %v1644_v22 }
 0x2fd   :  { %v1647_v27 = vadd.f32 %v1646_v26, %v1645_v25  ;;  %v2182_v25 = vld [vmem:[#allocation4 + $0x6] sm:$0x3] }
 0x2ff   :  { %1648 = vst.msk [vmem:[#allocation5 + $0x2] sm:$0x3] %vm1376_vm10, %v1647_v27  ;;  %3912 = vmatmul.mubr.msk.f32.vlgmr.msra.gmra.mrb[12].mxu0 %vm619_vm9, %v1647_v27  ;;  %3923 = vmatmul.mubr.msk.f32.vlgmr.msra.gmra.mrb[10].mxu1 %vm619_vm9, %v1647_v27 }
 0x300   :  { %4199 = vmatpush3.bf16.msra.mxu0 %v4622_v2  ;;  %3933 = vmatprep.mubr.msk.f32.mxu0 %vm4468_vm8, %v4469_v58 }
 0x301   :  { %4200 = vmatprep.subr.bf16.mxu0 %v4466_v45  ;;  %4205 = vmatpush3.bf16.msra.mxu1 %v4576_v48 }
 0x302   :  { %4206 = vmatprep.subr.bf16.mxu1 %v4466_v45  ;;  %3944 = vmatprep.mubr.msk.f32.mxu1 %vm4468_vm8, %v4469_v58 }
 0x304   :  { %4202 = vmatpush3.bf16.msra.mxu0 %v4632_v5 }
 0x305   :  { %4209 = vmatprep.subr.bf16.mxu0 %v4466_v45  ;;  %4208 = vmatpush3.bf16.msra.mxu1 %v4585_v55 }
 0x306   :  { %4215 = vmatprep.subr.bf16.mxu1 %v4466_v45 }
 0x307   :  { %3934 = vmatmul.mubr.msk.f32.vlgmr.msra.gmra.mrb[14].mxu0 %vm619_vm9, %v1647_v27 }
 0x308   :  { %4211 = vmatpush3.bf16.msra.mxu0 %v4596_v60  ;;  %3955 = vmatprep.mubr.msk.f32.mxu0 %vm4468_vm8, %v4469_v58 }
 0x309   :  { %4212 = vmatprep.subr.bf16.mxu0 %v4466_v45 }
 0x30c   :  { %4214 = vmatpush3.bf16.msra.mxu0 %v4608_v63 }
 0x30d   :  { %4221 = vmatprep.subr.bf16.mxu0 %v4466_v45 }
 0x3d2   :  { %v1729_v28 = vpop.f32.mrb[12].mxu0  ;;  %v1810_v29 = vpop.f32.mrb[10].mxu1 }
 0x3d3   :  { %v1730_v30 = vadd.f32 %v4661_v16, %v1729_v28  ;;  %v3913_v31 = vpop.f32.mrb[13].mxu0  ;;  %v3924_v32 = vpop.f32.mrb[11].mxu1  ;;  %v1811_v34 = vadd.f32 %v4670_v23, %v1810_v29 }
 0x3d5   :  { %v1896_v35 = vadd.f32 %v1895_v33, %v1730_v30  ;;  %v1904_v38 = vadd.f32 %v1903_v37, %v1811_v34 }
 0x3d7   :  { %v3553_v36 = vmul.f32 -1.442695, %v1896_v35  ;;  %v3554_v42 = vmul.f32 -1.442695, %v1904_v38  ;;  %v2437_v38 = vld [vmem:[#allocation2 + $0x8] sm:$0x3] }
 0x3d9   :  { %4386 = vpow2.f32 %v3553_v36 }
 0x3da   :  { %v1891_v39 = vpop.f32.mrb[14].mxu0  ;;  %4388 = vpow2.f32 %v3554_v42 }
 0x3db   :  { %v3935_v41 = vpop.f32.mrb[15].mxu0  ;;  %v1892_v49 = vadd.f32 %v4678_v40, %v1891_v39 }
 0x3e3   :  { %v4387_v43 = vpop.eup %4386 }
 0x3e4   :  { %v1900_v44 = vadd.f32 1.0, %v4387_v43  ;;  %v4389_v46 = vpop.eup %4388  ;;  %v2445_v43 = vld [vmem:[#allocation3 + $0x8] sm:$0x3] }
 0x3e5   :  { %v1908_v47 = vadd.f32 1.0, %v4389_v46 }
 0x3e6   :  { %4390 = vrcp.f32 %v1900_v44 }
 0x3e7   :  { %4392 = vrcp.f32 %v1908_v47 }
 0x3f0   :  { %v4391_v50 = vpop.eup %4390 }
 0x3f1   :  { %v1912_v51 = vmul.f32 %v4391_v50, %v1892_v49  ;;  %v4393_v54 = vpop.eup %4392 }
 0x3f2   :  { %v1915_v56 = vsub.f32 1.0, %v4393_v54  ;;  %v1917_v61 = vmul.f32 %v4393_v54, %v1647_v27 }
 0x3f3   :  { %v1913_v53 = vadd.f32 %v1912_v51, %v1911_v52 }
 0x3f5   :  { %4394 = vtanh.f32 %v1913_v53 }
 0x3ff   :  { %v4395_v57 = vpop.eup %4394 }
 0x400   :  { %v1916_v59 = vmul.f32 %v4395_v57, %v1915_v56 }
 0x402   :  { %v1918_v62 = vadd.f32 %v1917_v61, %v1916_v59  ;;  %v2453_v59 = vld [vmem:[#allocation4 + $0x8] sm:$0x3] }
 0x404   :  { %1919 = vst.msk [vmem:[#allocation5 + $0x4] sm:$0x3] %vm1376_vm10, %v1918_v62  ;;  %3945 = vmatmul.mubr.msk.f32.vlgmr.msra.gmra.mrb[12].mxu1 %vm619_vm9, %v1918_v62  ;;  %3956 = vmatmul.mubr.msk.f32.vlgmr.msra.gmra.mrb[16].mxu0 %vm619_vm9, %v1918_v62 }
 0x405   :  { %4217 = vmatpush3.bf16.msra.mxu1 %v4622_v2  ;;  %3966 = vmatprep.mubr.msk.f32.mxu1 %vm4468_vm8, %v4469_v58 }
 0x406   :  { %4218 = vmatprep.subr.bf16.mxu1 %v4466_v45  ;;  %4223 = vmatpush3.bf16.msra.mxu0 %v4576_v48 }
 0x407   :  { %4224 = vmatprep.subr.bf16.mxu0 %v4466_v45  ;;  %3977 = vmatprep.mubr.msk.f32.mxu0 %vm4468_vm8, %v4469_v58 }
 0x409   :  { %4220 = vmatpush3.bf16.msra.mxu1 %v4632_v5 }
 0x40a   :  { %4227 = vmatprep.subr.bf16.mxu1 %v4466_v45  ;;  %4226 = vmatpush3.bf16.msra.mxu0 %v4585_v55 }
 0x40b   :  { %4233 = vmatprep.subr.bf16.mxu0 %v4466_v45 }
 0x40c   :  { %3967 = vmatmul.mubr.msk.f32.vlgmr.msra.gmra.mrb[14].mxu1 %vm619_vm9, %v1918_v62 }
 0x40d   :  { %4229 = vmatpush3.bf16.msra.mxu1 %v4596_v60  ;;  %3988 = vmatprep.mubr.msk.f32.mxu1 %vm4468_vm8, %v4469_v58 }
 0x40e   :  { %4230 = vmatprep.subr.bf16.mxu1 %v4466_v45 }
 0x411   :  { %4232 = vmatpush3.bf16.msra.mxu1 %v4608_v63 }
 0x412   :  { %4239 = vmatprep.subr.bf16.mxu1 %v4466_v45 }
 0x4d7   :  { %v2000_v0 = vpop.f32.mrb[12].mxu1  ;;  %v2081_v1 = vpop.f32.mrb[16].mxu0 }
 0x4d8   :  { %v2001_v3 = vadd.f32 %v4661_v16, %v2000_v0  ;;  %v3946_v4 = vpop.f32.mrb[13].mxu1  ;;  %v3957_v6 = vpop.f32.mrb[17].mxu0  ;;  %v2082_v8 = vadd.f32 %v4670_v23, %v2081_v1 }
 0x4da   :  { %v2167_v9 = vadd.f32 %v2166_v7, %v2001_v3  ;;  %v2175_v12 = vadd.f32 %v2174_v11, %v2082_v8 }
 0x4dc   :  { %v3561_v10 = vmul.f32 -1.442695, %v2167_v9  ;;  %v3562_v15 = vmul.f32 -1.442695, %v2175_v12 }
 0x4de   :  { %4396 = vpow2.f32 %v3561_v10  ;;  %v2708_v10 = vld [vmem:[#allocation2 + $0xa] sm:$0x3] }
 0x4df   :  { %v2162_v13 = vpop.f32.mrb[14].mxu1  ;;  %4398 = vpow2.f32 %v3562_v15 }
 0x4e0   :  { %v3968_v14 = vpop.f32.mrb[15].mxu1  ;;  %v2163_v21 = vadd.f32 %v4678_v40, %v2162_v13  ;;  %v2716_v13 = vld [vmem:[#allocation3 + $0xa] sm:$0x3] }
 0x4e8   :  { %v4397_v17 = vpop.eup %4396 }
 0x4e9   :  { %v2171_v18 = vadd.f32 1.0, %v4397_v17  ;;  %v4399_v19 = vpop.eup %4398 }
 0x4ea   :  { %v2179_v20 = vadd.f32 1.0, %v4399_v19 }
 0x4eb   :  { %4400 = vrcp.f32 %v2171_v18 }
 0x4ec   :  { %4402 = vrcp.f32 %v2179_v20 }
 0x4f5   :  { %v4401_v22 = vpop.eup %4400 }
 0x4f6   :  { %v2183_v24 = vmul.f32 %v4401_v22, %v2163_v21  ;;  %v4403_v27 = vpop.eup %4402 }
 0x4f7   :  { %v2186_v28 = vsub.f32 1.0, %v4403_v27  ;;  %v2188_v31 = vmul.f32 %v4403_v27, %v1918_v62 }
 0x4f8   :  { %v2184_v26 = vadd.f32 %v2183_v24, %v2182_v25 }
 0x4fa   :  { %4404 = vtanh.f32 %v2184_v26  ;;  %v2724_v26 = vld [vmem:[#allocation4 + $0xa] sm:$0x3] }
 0x504   :  { %v4405_v29 = vpop.eup %4404 }
 0x505   :  { %v2187_v30 = vmul.f32 %v4405_v29, %v2186_v28 }
 0x507   :  { %v2189_v32 = vadd.f32 %v2188_v31, %v2187_v30 }
 0x509   :  { %2190 = vst.msk [vmem:[#allocation5 + $0x6] sm:$0x3] %vm1376_vm10, %v2189_v32  ;;  %3978 = vmatmul.mubr.msk.f32.vlgmr.msra.gmra.mrb[18].mxu0 %vm619_vm9, %v2189_v32  ;;  %3989 = vmatmul.mubr.msk.f32.vlgmr.msra.gmra.mrb[16].mxu1 %vm619_vm9, %v2189_v32 }
 0x50a   :  { %4235 = vmatpush3.bf16.msra.mxu0 %v4622_v2  ;;  %3999 = vmatprep.mubr.msk.f32.mxu0 %vm4468_vm8, %v4469_v58 }
 0x50b   :  { %4236 = vmatprep.subr.bf16.mxu0 %v4466_v45  ;;  %4241 = vmatpush3.bf16.msra.mxu1 %v4576_v48 }
 0x50c   :  { %4242 = vmatprep.subr.bf16.mxu1 %v4466_v45  ;;  %4010 = vmatprep.mubr.msk.f32.mxu1 %vm4468_vm8, %v4469_v58 }
 0x50e   :  { %4238 = vmatpush3.bf16.msra.mxu0 %v4632_v5 }
 0x50f   :  { %4245 = vmatprep.subr.bf16.mxu0 %v4466_v45  ;;  %4244 = vmatpush3.bf16.msra.mxu1 %v4585_v55 }
 0x510   :  { %4251 = vmatprep.subr.bf16.mxu1 %v4466_v45 }
 0x511   :  { %4000 = vmatmul.mubr.msk.f32.vlgmr.msra.gmra.mrb[20].mxu0 %vm619_vm9, %v2189_v32 }
 0x512   :  { %4247 = vmatpush3.bf16.msra.mxu0 %v4596_v60  ;;  %4021 = vmatprep.mubr.msk.f32.mxu0 %vm4468_vm8, %v4469_v58 }
 0x513   :  { %4248 = vmatprep.subr.bf16.mxu0 %v4466_v45 }
 0x516   :  { %4250 = vmatpush3.bf16.msra.mxu0 %v4608_v63 }
 0x517   :  { %4257 = vmatprep.subr.bf16.mxu0 %v4466_v45 }
 0x5dc   :  { %v2271_v33 = vpop.f32.mrb[18].mxu0  ;;  %v2352_v34 = vpop.f32.mrb[16].mxu1 }
 0x5dd   :  { %v2272_v35 = vadd.f32 %v4661_v16, %v2271_v33  ;;  %v3979_v36 = vpop.f32.mrb[19].mxu0  ;;  %v3990_v37 = vpop.f32.mrb[17].mxu1  ;;  %v2353_v39 = vadd.f32 %v4670_v23, %v2352_v34  ;;  %v3005_v34 = vld [vmem:[%s4550_s9 + $0x8] sm:$0xff] }
 0x5de   :  { %v3089_v37 = vld [vmem:[%s4572_s21 + $0x8] sm:$0xff] }
 0x5df   :  { %v2438_v41 = vadd.f32 %v2437_v38, %v2272_v35  ;;  %v2446_v44 = vadd.f32 %v2445_v43, %v2353_v39  ;;  %v3088_v35 = vld [vmem:[%s4572_s21] sm:$0xff]  ;;  %v3006_v38 = vld [vmem:[%s4550_s9 + $0x10] sm:$0xff]  ;;  %v3007_v39 = vld [vmem:[%s4550_s9 + $0x18] sm:$0xff] }
 0x5e0   :  { %v3091_v43 = vld [vmem:[%s4572_s21 + $0x18] sm:$0xff] }
 0x5e1   :  { %v3569_v42 = vmul.f32 -1.442695, %v2438_v41  ;;  %v3570_v49 = vmul.f32 -1.442695, %v2446_v44  ;;  %v4282_v41 = vpack.c.bf16 %v3089_v37, %v3088_v35 }
 0x5e3   :  { %4406 = vpow2.f32 %v3569_v42  ;;  %v3090_v42 = vld [vmem:[%s4572_s21 + $0x10] sm:$0xff] }
 0x5e4   :  { %v2433_v46 = vpop.f32.mrb[20].mxu0  ;;  %4408 = vpow2.f32 %v3570_v49  ;;  %v4285_v44 = vpack.c.bf16 %v3091_v43, %v3090_v42 }
 0x5e5   :  { %v4001_v47 = vpop.f32.mrb[21].mxu0  ;;  %v2434_v54 = vadd.f32 %v4678_v40, %v2433_v46 }
 0x5ed   :  { %v4407_v50 = vpop.eup %4406 }
 0x5ee   :  { %v2442_v51 = vadd.f32 1.0, %v4407_v50  ;;  %v4409_v52 = vpop.eup %4408 }
 0x5ef   :  { %v2450_v53 = vadd.f32 1.0, %v4409_v52  ;;  %v2979_v52 = vld [vmem:[#allocation2 + $0xc] sm:$0x3] }
 0x5f0   :  { %4410 = vrcp.f32 %v2442_v51 }
 0x5f1   :  { %4412 = vrcp.f32 %v2450_v53 }
 0x5fa   :  { %v4411_v56 = vpop.eup %4410 }
 0x5fb   :  { %v2454_v57 = vmul.f32 %v4411_v56, %v2434_v54  ;;  %v4413_v62 = vpop.eup %4412 }
 0x5fc   :  { %v2457_v0 = vsub.f32 1.0, %v4413_v62  ;;  %v2459_v4 = vmul.f32 %v4413_v62, %v2189_v32 }
 0x5fd   :  { %v2455_v61 = vadd.f32 %v2454_v57, %v2453_v59  ;;  %v2987_v57 = vld [vmem:[#allocation3 + $0xc] sm:$0x3] }
 0x5ff   :  { %4414 = vtanh.f32 %v2455_v61 }
 0x609   :  { %v4415_v1 = vpop.eup %4414 }
 0x60a   :  { %v2458_v3 = vmul.f32 %v4415_v1, %v2457_v0 }
 0x60c   :  { %v2460_v6 = vadd.f32 %v2459_v4, %v2458_v3 }
 0x60e   :  { %2461 = vst.msk [vmem:[#allocation5 + $0x8] sm:$0x3] %vm1376_vm10, %v2460_v6  ;;  %4011 = vmatmul.mubr.msk.f32.vlgmr.msra.gmra.mrb[18].mxu1 %vm619_vm9, %v2460_v6  ;;  %4022 = vmatmul.mubr.msk.f32.vlgmr.msra.gmra.mrb[22].mxu0 %vm619_vm9, %v2460_v6 }
 0x60f   :  { %4253 = vmatpush3.bf16.msra.mxu1 %v4622_v2  ;;  %4032 = vmatprep.mubr.msk.f32.mxu1 %vm4468_vm8, %v4469_v58 }
 0x610   :  { %4254 = vmatprep.subr.bf16.mxu1 %v4466_v45  ;;  %4259 = vmatpush3.bf16.msra.mxu0 %v4576_v48 }
 0x611   :  { %4260 = vmatprep.subr.bf16.mxu0 %v4466_v45  ;;  %4043 = vmatprep.mubr.msk.f32.mxu0 %vm4468_vm8, %v4469_v58 }
 0x613   :  { %4256 = vmatpush3.bf16.msra.mxu1 %v4632_v5 }
 0x614   :  { %4263 = vmatprep.subr.bf16.mxu1 %v4466_v45  ;;  %4262 = vmatpush3.bf16.msra.mxu0 %v4585_v55 }
 0x615   :  { %4269 = vmatprep.subr.bf16.mxu0 %v4466_v45 }
 0x616   :  { %4033 = vmatmul.mubr.msk.f32.vlgmr.msra.gmra.mrb[20].mxu1 %vm619_vm9, %v2460_v6 }
 0x617   :  { %4265 = vmatpush3.bf16.msra.mxu1 %v4596_v60  ;;  %4054 = vmatprep.mubr.msk.f32.mxu1 %vm4468_vm8, %v4469_v58 }
 0x618   :  { %4266 = vmatprep.subr.bf16.mxu1 %v4466_v45 }
 0x61b   :  { %4268 = vmatpush3.bf16.msra.mxu1 %v4608_v63 }
 0x61c   :  { %4275 = vmatprep.subr.bf16.mxu1 %v4466_v45 }
 0x6e1   :  { %v2542_v48 = vpop.f32.mrb[18].mxu1  ;;  %v2623_v7 = vpop.f32.mrb[22].mxu0 }
 0x6e2   :  { %v2543_v8 = vadd.f32 %v4661_v16, %v2542_v48  ;;  %v4012_v55 = vpop.f32.mrb[19].mxu1  ;;  %v4023_v9 = vpop.f32.mrb[23].mxu0  ;;  %v2624_v11 = vadd.f32 %v4670_v23, %v2623_v7 }
 0x6e3   :  { %v2995_v55 = vld [vmem:[#allocation4 + $0xc] sm:$0x3] }
 0x6e4   :  { %v2709_v12 = vadd.f32 %v2708_v10, %v2543_v8  ;;  %v2717_v14 = vadd.f32 %v2716_v13, %v2624_v11 }
 0x6e6   :  { %v3577_v60 = vmul.f32 -1.442695, %v2709_v12  ;;  %v3578_v18 = vmul.f32 -1.442695, %v2717_v14  ;;  %v3169_v12 = vld [vmem:[%s4604_s25] sm:$0xff] }
 0x6e8   :  { %4416 = vpow2.f32 %v3577_v60  ;;  %v3170_v60 = vld [vmem:[%s4604_s25 + $0x8] sm:$0xff] }
 0x6e9   :  { %v2704_v15 = vpop.f32.mrb[20].mxu1  ;;  %4418 = vpow2.f32 %v3578_v18 }
 0x6ea   :  { %v4034_v17 = vpop.f32.mrb[21].mxu1  ;;  %v2705_v22 = vadd.f32 %v4678_v40, %v2704_v15 }
 0x6eb   :  { %v4288_v17 = vpack.c.bf16 %v3170_v60, %v3169_v12  ;;  %v3598_v12 = vld [vmem:[%s3501_s5] ss:$0 sm:$0xff] }
 0x6f2   :  { %v4417_v63 = vpop.eup %4416 }
 0x6f3   :  { %v2713_v19 = vadd.f32 1.0, %v4417_v63  ;;  %v4419_v20 = vpop.eup %4418  ;;  %v3171_v63 = vld [vmem:[%s4604_s25 + $0x10] sm:$0xff] }
 0x6f4   :  { %v2721_v21 = vadd.f32 1.0, %v4419_v20  ;;  %v3275_v20 = vld [vmem:[#allocation5] sm:$0xff] }
 0x6f5   :  { %4420 = vrcp.f32 %v2713_v19  ;;  %v3172_v19 = vld [vmem:[%s4604_s25 + $0x18] sm:$0xff] }
 0x6f6   :  { %4422 = vrcp.f32 %v2721_v21  ;;  %v4291_v21 = vpack.c.bf16 %v3172_v19, %v3171_v63 }
 0x6ff   :  { %v4421_v24 = vpop.eup %4420 }
 0x700   :  { %v2725_v25 = vmul.f32 %v4421_v24, %v2705_v22  ;;  %v4423_v28 = vpop.eup %4422 }
 0x701   :  { %v2728_v29 = vsub.f32 1.0, %v4423_v28  ;;  %v2730_v32 = vmul.f32 %v4423_v28, %v2460_v6 }
 0x702   :  { %v2726_v27 = vadd.f32 %v2725_v25, %v2724_v26 }
 0x704   :  { %4424 = vtanh.f32 %v2726_v27 }
 0x70e   :  { %v4425_v30 = vpop.eup %4424 }
 0x70f   :  { %v2729_v31 = vmul.f32 %v4425_v30, %v2728_v29  ;;  %v3371_v29 = vld [vmem:[%s4865_s27 + $0x10] sm:$0xff] }
 0x711   :  { %v4806_v33 = vadd.f32 %v2730_v32, %v2729_v31  ;;  %v3372_v31 = vld [vmem:[%s4865_s27 + $0x18] sm:$0xff] }
 0x712   :  { %v4305_v32 = vpack.c.bf16 %v3372_v31, %v3371_v29 }
 0x713   :  { %2732 = vst.msk [vmem:[#allocation5 + $0xa] sm:$0x3] %vm1376_vm10, %v4806_v33  ;;  %4044 = vmatmul.mubr.msk.f32.vlgmr.msra.gmra.mrb[24].mxu0 %vm619_vm9, %v4806_v33  ;;  %4055 = vmatmul.mubr.msk.f32.vlgmr.msra.gmra.mrb[22].mxu1 %vm619_vm9, %v4806_v33 }
 0x714   :  { %4271 = vmatpush3.bf16.msra.mxu0 %v4622_v2  ;;  %4065 = vmatprep.mubr.msk.f32.mxu0 %vm4468_vm8, %v4469_v58  ;;  %v3004_v2 = vld [vmem:[%s4550_s9] sm:$0xff]  ;;  %s4477_s9 = smov 27  }
 0x715   :  { %4272 = vmatprep.subr.bf16.mxu0 %v4466_v45  ;;  %4076 = vmatprep.mubr.msk.f32.mxu1 %vm4468_vm8, %v4469_v58  ;;  %v4276_v36 = vpack.c.bf16 %v3005_v34, %v3004_v2  ;;  %s3498_s23 = sld [smem:[%s4890_s0 + %s4477_s9]]   ;;  %v3374_v2 = vld [vmem:[%s4865_s27 + $0x28] sm:$0xff] }
 0x717   :  { %4277 = vmatpush3.bf16.msra.mxu1 %v4276_v36 }
 0x718   :  { %4274 = vmatpush3.bf16.msra.mxu0 %v4632_v5  ;;  %v4279_v5 = vpack.c.bf16 %v3007_v39, %v3006_v38  ;;  %4278 = vmatprep.subr.bf16.mxu1 %v4466_v45 }
 0x719   :  { %4281 = vmatprep.subr.bf16.mxu0 %v4466_v45 }
 0x71b   :  { %4066 = vmatmul.mubr.msk.f32.vlgmr.msra.gmra.mrb[26].mxu0 %vm619_vm9, %v4806_v33  ;;  %4280 = vmatpush3.bf16.msra.mxu1 %v4279_v5  ;;  %v3277_v22 = vld [vmem:[%s3498_s23] sm:$0xff]  ;;  %v3278_v24 = vld [vmem:[%s3498_s23 + $0x8] sm:$0xff]  ;;  %v3279_v25 = vld [vmem:[%s3498_s23 + $0x10] sm:$0xff] }
 0x71c   :  { %4087 = vmatprep.mubr.msk.f32.mxu0 %vm4468_vm8, %v4469_v58  ;;  %4283 = vmatpush3.bf16.msra.mxu0 %v4282_v41  ;;  %v4293_v26 = vpack.c.bf16 %v3278_v24, %v3277_v22  ;;  %v3280_v27 = vld [vmem:[%s3498_s23 + $0x18] sm:$0xff]  ;;  %v3250_v41 = vld [vmem:[#allocation2 + $0xe] sm:$0x3] }
 0x71d   :  { %4284 = vmatprep.subr.bf16.mxu0 %v4466_v45  ;;  %4287 = vmatprep.subr.bf16.mxu1 %v4466_v45  ;;  %v4297_v28 = vpack.c.bf16 %v3280_v27, %v3279_v25 }
 0x720   :  { %4286 = vmatpush3.bf16.msra.mxu0 %v4285_v44  ;;  %v3258_v44 = vld [vmem:[#allocation3 + $0xe] sm:$0x3] }
 0x721   :  { %4294 = vmatprep.subr.bf16.mxu0 %v4293_v26 }
 0x7e6   :  { %v2813_v46 = vpop.f32.mrb[24].mxu0  ;;  %v2894_v47 = vpop.f32.mrb[22].mxu1 }
 0x7e7   :  { %v2814_v49 = vadd.f32 %v4661_v16, %v2813_v46  ;;  %v4045_v50 = vpop.f32.mrb[25].mxu0  ;;  %v4056_v51 = vpop.f32.mrb[23].mxu1  ;;  %v2895_v53 = vadd.f32 %v4670_v23, %v2894_v47 }
 0x7e9   :  { %v2980_v54 = vadd.f32 %v2979_v52, %v2814_v49  ;;  %v2988_v59 = vadd.f32 %v2987_v57, %v2895_v53  ;;  %v3266_v57 = vld [vmem:[#allocation4 + $0xe] sm:$0x3] }
 0x7eb   :  { %v3585_v56 = vmul.f32 -1.442695, %v2980_v54  ;;  %v3586_v0 = vmul.f32 -1.442695, %v2988_v59 }
 0x7ed   :  { %4426 = vpow2.f32 %v3585_v56 }
 0x7ee   :  { %v2975_v61 = vpop.f32.mrb[26].mxu0  ;;  %4428 = vpow2.f32 %v3586_v0 }
 0x7ef   :  { %v4067_v62 = vpop.f32.mrb[27].mxu0  ;;  %v2976_v48 = vadd.f32 %v4678_v40, %v2975_v61 }
 0x7f7   :  { %v4427_v1 = vpop.eup %4426 }
 0x7f8   :  { %v2984_v3 = vadd.f32 1.0, %v4427_v1  ;;  %v4429_v4 = vpop.eup %4428 }
 0x7f9   :  { %v2992_v6 = vadd.f32 1.0, %v4429_v4 }
 0x7fa   :  { %4430 = vrcp.f32 %v2984_v3 }
 0x7fb   :  { %4432 = vrcp.f32 %v2992_v6 }
 0x804   :  { %v4431_v7 = vpop.eup %4430 }
 0x805   :  { %v2996_v8 = vmul.f32 %v4431_v7, %v2976_v48  ;;  %v4433_v10 = vpop.eup %4432  ;;  %v3376_v48 = vld [vmem:[%s4865_s27 + $0x38] sm:$0xff] }
 0x806   :  { %v2999_v11 = vsub.f32 1.0, %v4433_v10  ;;  %v3001_v15 = vmul.f32 %v4433_v10, %v4806_v33  ;;  %v3373_v33 = vld [vmem:[%s4865_s27 + $0x20] sm:$0xff] }
 0x807   :  { %v2997_v9 = vadd.f32 %v2996_v8, %v2995_v55  ;;  %v4309_v34 = vpack.c.bf16 %v3374_v2, %v3373_v33  ;;  %v3595_v8 = vld [vmem:[%s3499_s1] ss:$0 sm:$0xff] }
 0x809   :  { %4434 = vtanh.f32 %v2997_v9 }
 0x813   :  { %v4435_v13 = vpop.eup %4434 }
 0x814   :  { %v3000_v14 = vmul.f32 %v4435_v13, %v2999_v11 }
 0x816   :  { %v4843_v18 = vadd.f32 %v3001_v15, %v3000_v14 }
 0x818   :  { %3003 = vst.msk [vmem:[#allocation5 + $0xc] sm:$0x3] %vm1376_vm10, %v4843_v18  ;;  %4077 = vmatmul.mubr.msk.f32.vlgmr.msra.gmra.mrb[24].mxu1 %vm619_vm9, %v4843_v18  ;;  %4088 = vmatmul.mubr.msk.f32.vlgmr.msra.gmra.mrb[28].mxu0 %vm619_vm9, %v4843_v18 }
 0x819   :  { %4289 = vmatpush3.bf16.msra.mxu1 %v4288_v17  ;;  %4109 = vmatprep.mubr.msk.f32.mxu0 %vm619_vm9, %v3275_v20 }
 0x81a   :  { %4290 = vmatprep.subr.bf16.mxu1 %v4466_v45  ;;  %4098 = vmatprep.mubr.msk.f32.mxu1 %vm4468_vm8, %v4469_v58  ;;  %v3369_v45 = vld [vmem:[%s4865_s27] sm:$0xff]  ;;  %v3370_v58 = vld [vmem:[%s4865_s27 + $0x8] sm:$0xff] }
 0x81b   :  { %4296 = vmatpush3.bf16.msra.mxu0 %v4293_v26  ;;  %v4301_v30 = vpack.c.bf16 %v3370_v58, %v3369_v45 }
 0x81c   :  { %4298 = vmatprep.subr.bf16.mxu0 %v4297_v28 }
 0x81d   :  { %4292 = vmatpush3.bf16.msra.mxu1 %v4291_v21 }
 0x81e   :  { %4302 = vmatprep.subr.bf16.mxu1 %v4301_v30 }
 0x81f   :  { %4300 = vmatpush3.bf16.msra.mxu0 %v4297_v28 }
 0x820   :  { %4099 = vmatmul.mubr.msk.f32.vlgmr.msra.gmra.mrb[26].mxu1 %vm619_vm9, %v4843_v18 }
 0x821   :  { %4304 = vmatpush3.bf16.msra.mxu1 %v4301_v30 }
 0x822   :  { %4306 = vmatprep.subr.bf16.mxu1 %v4305_v32 }
 0x825   :  { %4308 = vmatpush3.bf16.msra.mxu1 %v4305_v32 }
 0x826   :  { %4310 = vmatprep.subr.bf16.mxu1 %v4309_v34 }
 0x829   :  { %4312 = vmatpush3.bf16.msra.mxu1 %v4309_v34 }
 0x8eb   :  { %v3084_v35 = vpop.f32.mrb[24].mxu1  ;;  %v3165_v36 = vpop.f32.mrb[28].mxu0 }
 0x8ec   :  { %v3085_v37 = vadd.f32 %v4661_v16, %v3084_v35  ;;  %v4078_v38 = vpop.f32.mrb[25].mxu1  ;;  %v4089_v39 = vpop.f32.mrb[29].mxu0  ;;  %v3166_v42 = vadd.f32 %v4670_v23, %v3165_v36 }
 0x8ee   :  { %v3251_v43 = vadd.f32 %v3250_v41, %v3085_v37  ;;  %v3259_v46 = vadd.f32 %v3258_v44, %v3166_v42 }
 0x8f0   :  { %v3593_v5 = vmul.f32 -1.442695, %v3251_v43  ;;  %v3594_v50 = vmul.f32 -1.442695, %v3259_v46 }
 0x8f2   :  { %4436 = vpow2.f32 %v3593_v5 }
 0x8f3   :  { %v3246_v47 = vpop.f32.mrb[26].mxu1  ;;  %4438 = vpow2.f32 %v3594_v50 }
 0x8f4   :  { %v4100_v49 = vpop.f32.mrb[27].mxu1  ;;  %v3247_v16 = vadd.f32 %v4678_v40, %v3246_v47  ;;  %v3375_v40 = vld [vmem:[%s4865_s27 + $0x30] sm:$0xff] }
 0x8f5   :  { %v4313_v7 = vpack.c.bf16 %v3376_v48, %v3375_v40 }
 0x8f7   :  { %4314 = vmatprep.subr.bf16.mxu1 %v4313_v7 }
 0x8f8   :  { %4316 = vmatpush3.bf16.msra.mxu1 %v4313_v7 }
 0x8fc   :  { %v4437_v51 = vpop.eup %4436 }
 0x8fd   :  { %v3255_v52 = vadd.f32 1.0, %v4437_v51  ;;  %v4439_v53 = vpop.eup %4438 }
 0x8fe   :  { %v3263_v54 = vadd.f32 1.0, %v4439_v53 }
 0x8ff   :  { %4440 = vrcp.f32 %v3255_v52 }
 0x900   :  { %4442 = vrcp.f32 %v3263_v54 }
 0x909   :  { %v4441_v56 = vpop.eup %4440 }
 0x90a   :  { %v3267_v23 = vmul.f32 %v4441_v56, %v3247_v16  ;;  %v4443_v61 = vpop.eup %4442 }
 0x90b   :  { %v3270_v62 = vsub.f32 1.0, %v4443_v61  ;;  %v3272_v1 = vmul.f32 %v4443_v61, %v4843_v18 }
 0x90c   :  { %v3268_v59 = vadd.f32 %v3267_v23, %v3266_v57 }
 0x90e   :  { %4444 = vtanh.f32 %v3268_v59 }
 0x918   :  { %v4445_v0 = vpop.eup %4444 }
 0x919   :  { %v3271_v3 = vmul.f32 %v4445_v0, %v3270_v62 }
 0x91b   :  { %v3273_v4 = vadd.f32 %v3272_v1, %v3271_v3 }
 0x91d   :  { %3274 = vst.msk [vmem:[#allocation5 + $0xe] sm:$0x3] %vm1376_vm10, %v3273_v4 }
 0x924   :  { %v3276_v6 = vld [vmem:[#allocation5 + $0x8] sm:$0xff] }
 0x925   :  { %4110 = vmatmul.mubr.msk.f32.vlgmr.msra.gmra.mrb[30].mxu0 %vm619_vm9, %v3276_v6 }
 0x9f8   :  { %v4111_v55 = vpop.f32.mrb[30].mxu0 }
 0x9f9   :  { %v3360_v9 = vpop.f32.mrb[31].mxu0  ;;  %v3366_v11 = vadd.f32 %v4111_v55, %v3595_v8 }
 0x9fa   :  { %v3361_v10 = vadd.f32 %v3595_v8, %v3360_v9 }
 0x9fc   :  { %4128 = vmatprep.mubr.msk.f32.mxu1 %vm3384_vm11, %v3361_v10 }
 0x9fd   :  { %4129 = vmatmul.mubr.msk.f32.vlgmr.msra.gmra.mrb[28].mxu1 %vm3384_vm11, %v3366_v11 }
 0xad0   :  { %v4130_v60 = vpop.f32.mrb[28].mxu1 }
 0xad1   :  { %v3463_v13 = vadd.f32 %v4130_v60, %v3598_v12  ;;  %v3457_v14 = vpop.f32.mrb[29].mxu1 }
 0xad2   :  { %v3458_v15 = vadd.f32 %v3598_v12, %v3457_v14 }
 0xad3   :  { %3467 = vst [vmem:[%s3502_s10 + $0x8] sm:$0xff] %v3463_v13 }
 0xad4   :  { %3466 = vst [vmem:[%s3502_s10] sm:$0xff] %v3458_v15 }

</bundles_post_ra>
